<compile_context>
chip_gen: v7x
topology: tpu7x:2x2x1
jax: 0.10.0
libtpu: 0.0.40
codegen_flags: <defaults>
</compile_context>

<pallas_src>
import functools

import jax
import jax.numpy as jnp
from jax import lax
from jax.experimental import pallas as pl
from jax.experimental.pallas import tpu as pltpu


# ---------------------------------------------------------------------------
# In-kernel morphology helpers.  `x` is an (H, BTW) float32 slab packing
# several (H, W) images side by side along the lane axis.  `masks` holds the
# four hoisted validity masks ((up_ok, down_ok), (left_ok, right_ok)).
# ---------------------------------------------------------------------------
def _neighbors(x, axis, masks_pair, fill):
    n = x.shape[axis]
    valid_prev, valid_next = masks_pair
    # out[i] = x[i-1] (previous neighbor); wrapped/boundary positions -> fill.
    prev = jnp.where(valid_prev, pltpu.roll(x, shift=1, axis=axis), fill)
    # out[i] = x[i+1] via a rotate by (n - 1); pltpu.roll requires shift >= 0.
    nxt = jnp.where(valid_next, pltpu.roll(x, shift=n - 1, axis=axis), fill)
    return prev, nxt


def _soft_erode(x, masks):
    h_masks, w_masks = masks
    up, down = _neighbors(x, 0, h_masks, jnp.inf)
    p1 = jnp.minimum(jnp.minimum(up, x), down)       # (3, 1) min-pool
    left, right = _neighbors(x, 1, w_masks, jnp.inf)
    p2 = jnp.minimum(jnp.minimum(left, x), right)    # (1, 3) min-pool
    return jnp.minimum(p1, p2)


def _soft_dilate(x, masks):
    h_masks, w_masks = masks
    up, down = _neighbors(x, 0, h_masks, -jnp.inf)
    m = jnp.maximum(jnp.maximum(up, x), down)
    left, right = _neighbors(m, 1, w_masks, -jnp.inf)
    return jnp.maximum(jnp.maximum(left, m), right)  # separable (3, 3) max-pool


def _soft_skel(img, n_iter, masks):
    # Mathematically identical to the PyTorch soft_skel, but the erosion done
    # inside soft_open(img) = dilate(erode(img)) is reused as the next
    # iteration's image (1 + n_iter erosions instead of 1 + 2*n_iter).
    e = _soft_erode(img, masks)
    skel = jnp.maximum(img - _soft_dilate(e, masks), 0.0)
    for _ in range(n_iter):
        img = e
        e = _soft_erode(img, masks)
        delta = jnp.maximum(img - _soft_dilate(e, masks), 0.0)
        skel = skel + jnp.maximum(delta - skel * delta, 0.0)
    return skel


# ---------------------------------------------------------------------------
# Pallas kernel: one packed block of B_TILE images per grid step; emits a
# lane-dense (8, 128) tile holding the 4 partial sums for that block.
# ---------------------------------------------------------------------------
def _cldice_kernel(col_ref, pred_ref, true_ref, out_ref, *, n_iter, img_w):
    pred = pred_ref[...].astype(jnp.float32)   # (H, BTW)
    true = true_ref[...].astype(jnp.float32)
    h, btw = pred.shape

    # ---- hoisted boundary masks (computed once, reused by every roll) ------
    row = lax.broadcasted_iota(jnp.int32, (h, btw), 0)
    h_masks = (row >= 1, row < h - 1)
    col = jnp.broadcast_to(col_ref[...], (h, btw))   # column index within image
    w_masks = (col >= 1, col <= img_w - 2)           # periodic image boundaries
    masks = (h_masks, w_masks)

    skel_pred = _soft_skel(pred, n_iter, masks)
    skel_true = _soft_skel(true, n_iter, masks)

    s_pt = jnp.sum(skel_pred * true, keepdims=True)   # (1, 1)
    s_p = jnp.sum(skel_pred, keepdims=True)
    s_ti = jnp.sum(skel_true * pred, keepdims=True)
    s_t = jnp.sum(skel_true, keepdims=True)

    # Lane-dense (8, 128) partial-sum tile: sublane i broadcasts sum i
    # (sublanes >= 3 repeat the last sum); the host reads [:, :4, 0].
    sub = lax.broadcasted_iota(jnp.int32, (8, 128), 0)
    out_ref[...] = jnp.where(sub == 0, s_pt,
                   jnp.where(sub == 1, s_p,
                   jnp.where(sub == 2, s_ti, s_t)))


# ---------------------------------------------------------------------------
# Host wrapper
# ---------------------------------------------------------------------------
def _choose_block_images(nc, h, w, max_block_bytes=1 << 20):
    """How many (h, w) images to pack per grid block along the lane axis.

    The block's lane width (d*w) must be a multiple of 128 or cover the full
    packed array; prefer the largest such d whose f32 block fits a small VMEM
    budget (keeps double-buffered inputs well under the default scoped VMEM
    limit on v5e/v6e/v7x).
    """
    legal = [d for d in range(1, nc + 1)
             if nc % d == 0 and ((d * w) % 128 == 0 or d == nc)]
    fitting = [d for d in legal if h * d * w * 4 <= max_block_bytes]
    return max(fitting) if fitting else min(legal)


def soft_cldice_loss(pred, y_true, iter_=3, smooth=1e-8):
    """Pallas TPU implementation of soft_cldice_loss.forward for NCHW inputs."""
    n, c, h, w = pred.shape
    nc = n * c

    # Pack all images side by side along the lane axis: (N*C, H, W) -> (H, N*C*W).
    def pack(x):
        return jnp.transpose(x.reshape(nc, h, w), (1, 0, 2)).reshape(h, nc * w)

    p = pack(pred)      # keep original dtype; kernel casts on load
    t = pack(y_true)

    b_tile = _choose_block_images(nc, h, w)
    num_blocks = nc // b_tile
    btw = b_tile * w

    # Column-within-image index, periodic along the packed lane axis.
    col = jnp.tile(jnp.arange(w, dtype=jnp.int32), b_tile).reshape(1, btw)

    kernel = functools.partial(_cldice_kernel, n_iter=iter_, img_w=w)

    params = dict(dimension_semantics=("parallel",))
    block_bytes = h * btw * 4
    if 6 * block_bytes > (12 << 20):
        # Large single-image slices: raise the scoped VMEM limit (capped with
        # v7x's 64 MiB physical VMEM in mind).
        # TODO(synk): for very large H*W, tile H with a 2*(iter_+1)-row halo
        # instead of relying on a bigger VMEM limit.
        params["vmem_limit_bytes"] = int(min(56 << 20, 8 * block_bytes))

    partial_sums = pl.pallas_call(
        kernel,
        out_shape=jax.ShapeDtypeStruct((num_blocks, 8, 128), jnp.float32),
        grid=(num_blocks,),
        in_specs=[
            pl.BlockSpec((1, btw), lambda b: (0, 0)),    # per-image column idx
            pl.BlockSpec((h, btw), lambda b: (0, b)),    # packed pred
            pl.BlockSpec((h, btw), lambda b: (0, b)),    # packed y_true
        ],
        out_specs=pl.BlockSpec((None, 8, 128), lambda b: (b, 0, 0)),
        compiler_params=pltpu.CompilerParams(**params),
    )(col, p, t)

    sums = jnp.sum(partial_sums[:, :4, 0], axis=0)       # (4,) global sums
    s_pt, s_p, s_ti, s_t = sums[0], sums[1], sums[2], sums[3]
    tprec = (s_pt + smooth) / (s_p + smooth)
    tsens = (s_ti + smooth) / (s_t + smooth)
    return 1.0 - 2.0 * (tprec * tsens) / (tprec + tsens)


# ---------------------------------------------------------------------------
# Pure-JAX reference (for correctness checking only)
# ---------------------------------------------------------------------------
def _ref_erode(x):  # x: (B, H, W)
    xh = jnp.pad(x, ((0, 0), (1, 1), (0, 0)), constant_values=jnp.inf)
    p1 = jnp.minimum(jnp.minimum(xh[:, :-2], xh[:, 1:-1]), xh[:, 2:])
    xw = jnp.pad(x, ((0, 0), (0, 0), (1, 1)), constant_values=jnp.inf)
    p2 = jnp.minimum(jnp.minimum(xw[:, :, :-2], xw[:, :, 1:-1]), xw[:, :, 2:])
    return jnp.minimum(p1, p2)


def _ref_dilate(x):
    xh = jnp.pad(x, ((0, 0), (1, 1), (0, 0)), constant_values=-jnp.inf)
    m = jnp.maximum(jnp.maximum(xh[:, :-2], xh[:, 1:-1]), xh[:, 2:])
    xw = jnp.pad(m, ((0, 0), (0, 0), (1, 1)), constant_values=-jnp.inf)
    return jnp.maximum(jnp.maximum(xw[:, :, :-2], xw[:, :, 1:-1]), xw[:, :, 2:])


def _ref_skel(x, n_iter):
    img = x
    skel = jax.nn.relu(img - _ref_dilate(_ref_erode(img)))
    for _ in range(n_iter):
        img = _ref_erode(img)
        delta = jax.nn.relu(img - _ref_dilate(_ref_erode(img)))
        skel = skel + jax.nn.relu(delta - skel * delta)
    return skel


def _ref_loss(pred, y_true, iter_=3, smooth=1e-8):
    n, c, h, w = pred.shape
    p = pred.reshape(n * c, h, w)
    t = y_true.reshape(n * c, h, w)
    sp = _ref_skel(p, iter_)
    st = _ref_skel(t, iter_)
    tprec = (jnp.sum(sp * t) + smooth) / (jnp.sum(sp) + smooth)
    tsens = (jnp.sum(st * p) + smooth) / (jnp.sum(st) + smooth)
    return 1.0 - 2.0 * (tprec * tsens) / (tprec + tsens)


if __name__ == "__main__":
    key = jax.random.PRNGKey(0)
    k1, k2 = jax.random.split(key)

    N, C, H, W = 2, 4, 16, 16
    # "prediction": soft probabilities in (0, 1)
    pred = jax.nn.sigmoid(jax.random.normal(k1, (N, C, H, W), jnp.float32))
    # "ground truth": binary mask
    y_true = (jax.random.uniform(k2, (N, C, H, W)) > 0.7).astype(jnp.float32)

    loss = soft_cldice_loss(pred, y_true, iter_=3, smooth=1e-8)
    loss = jax.block_until_ready(loss)

    ref = jax.block_until_ready(_ref_loss(pred, y_true, iter_=3, smooth=1e-8))
    assert jnp.allclose(loss, ref, atol=1e-5, rtol=1e-5), (loss, ref)

    print("KERNEL_OK")
</pallas_src>

<mosaic_0001>
module attributes {stable_mosaic.version = 11 : i64} {
  func.func @_cldice_kernel(%arg0: i32, %arg1: memref<1x128xi32, #tpu.memory_space<vmem>>, %arg2: memref<16x128xf32, #tpu.memory_space<vmem>>, %arg3: memref<16x128xf32, #tpu.memory_space<vmem>>, %arg4: memref<1x8x128xf32, #tpu.memory_space<vmem>>) attributes {dimension_semantics = [#tpu.dimension_semantics<parallel>], iteration_bounds = array<i64: 1>, scalar_prefetch = 0 : i64, scratch_operands = 0 : i64, tpu.core_type = #tpu.core_type<tc>, window_params = [{pipeline_mode = #tpu.pipeline_mode<synchronous>, transform_indices = @transform_0, window_bounds = array<i64: 1, 128>}, {transform_indices = @transform_1, window_bounds = array<i64: 16, 128>}, {transform_indices = @transform_2, window_bounds = array<i64: 16, 128>}, {transform_indices = @transform_3, window_bounds = array<i64: 1, 8, 128>}]} {
    %c0 = arith.constant 0 : index
    %c0_0 = arith.constant 0 : index
    %0 = vector.load %arg2[%c0, %c0_0] : memref<16x128xf32, #tpu.memory_space<vmem>>, vector<16x128xf32>
    %c0_1 = arith.constant 0 : index
    %c0_2 = arith.constant 0 : index
    %1 = vector.load %arg3[%c0_1, %c0_2] : memref<16x128xf32, #tpu.memory_space<vmem>>, vector<16x128xf32>
    %2 = tpu.iota {dimensions = array<i32: 0>} : vector<16x128xi32>
    %c1_i32 = arith.constant 1 : i32
    %3 = vector.broadcast %c1_i32 : i32 to vector<16x128xi32>
    %4 = arith.cmpi sge, %2, %3 : vector<16x128xi32>
    %c15_i32 = arith.constant 15 : i32
    %5 = vector.broadcast %c15_i32 : i32 to vector<16x128xi32>
    %6 = arith.cmpi slt, %2, %5 : vector<16x128xi32>
    %c0_3 = arith.constant 0 : index
    %c0_4 = arith.constant 0 : index
    %7 = vector.load %arg1[%c0_3, %c0_4] : memref<1x128xi32, #tpu.memory_space<vmem>>, vector<1x128xi32>
    %8 = vector.shape_cast %7 : vector<1x128xi32> to vector<1x128xi32>
    %9 = vector.broadcast %8 : vector<1x128xi32> to vector<16x128xi32>
    %c1_i32_5 = arith.constant 1 : i32
    %10 = vector.broadcast %c1_i32_5 : i32 to vector<16x128xi32>
    %11 = arith.cmpi sge, %9, %10 : vector<16x128xi32>
    %c14_i32 = arith.constant 14 : i32
    %12 = vector.broadcast %c14_i32 : i32 to vector<16x128xi32>
    %13 = arith.cmpi sle, %9, %12 : vector<16x128xi32>
    %c1_i32_6 = arith.constant 1 : i32
    %14 = tpu.dynamic_rotate %0 by %c1_i32_6 dim 0 : vector<16x128xf32>, i32 -> vector<16x128xf32>
    %cst = arith.constant 0x7F800000 : f32
    %15 = vector.broadcast %cst : f32 to vector<16x128xf32>
    %16 = arith.select %4, %14, %15 : vector<16x128xi1>, vector<16x128xf32>
    %c15_i32_7 = arith.constant 15 : i32
    %17 = tpu.dynamic_rotate %0 by %c15_i32_7 dim 0 : vector<16x128xf32>, i32 -> vector<16x128xf32>
    %cst_8 = arith.constant 0x7F800000 : f32
    %18 = vector.broadcast %cst_8 : f32 to vector<16x128xf32>
    %19 = arith.select %6, %17, %18 : vector<16x128xi1>, vector<16x128xf32>
    %20 = arith.minimumf %16, %0 : vector<16x128xf32>
    %21 = arith.minimumf %20, %19 : vector<16x128xf32>
    %c1_i32_9 = arith.constant 1 : i32
    %22 = tpu.dynamic_rotate %0 by %c1_i32_9 dim 1 : vector<16x128xf32>, i32 -> vector<16x128xf32>
    %cst_10 = arith.constant 0x7F800000 : f32
    %23 = vector.broadcast %cst_10 : f32 to vector<16x128xf32>
    %24 = arith.select %11, %22, %23 : vector<16x128xi1>, vector<16x128xf32>
    %c127_i32 = arith.constant 127 : i32
    %25 = tpu.dynamic_rotate %0 by %c127_i32 dim 1 : vector<16x128xf32>, i32 -> vector<16x128xf32>
    %cst_11 = arith.constant 0x7F800000 : f32
    %26 = vector.broadcast %cst_11 : f32 to vector<16x128xf32>
    %27 = arith.select %13, %25, %26 : vector<16x128xi1>, vector<16x128xf32>
    %28 = arith.minimumf %24, %0 : vector<16x128xf32>
    %29 = arith.minimumf %28, %27 : vector<16x128xf32>
    %30 = arith.minimumf %21, %29 : vector<16x128xf32>
    %c1_i32_12 = arith.constant 1 : i32
    %31 = tpu.dynamic_rotate %30 by %c1_i32_12 dim 0 : vector<16x128xf32>, i32 -> vector<16x128xf32>
    %cst_13 = arith.constant 0xFF800000 : f32
    %32 = vector.broadcast %cst_13 : f32 to vector<16x128xf32>
    %33 = arith.select %4, %31, %32 : vector<16x128xi1>, vector<16x128xf32>
    %c15_i32_14 = arith.constant 15 : i32
    %34 = tpu.dynamic_rotate %30 by %c15_i32_14 dim 0 : vector<16x128xf32>, i32 -> vector<16x128xf32>
    %cst_15 = arith.constant 0xFF800000 : f32
    %35 = vector.broadcast %cst_15 : f32 to vector<16x128xf32>
    %36 = arith.select %6, %34, %35 : vector<16x128xi1>, vector<16x128xf32>
    %37 = arith.maximumf %33, %30 : vector<16x128xf32>
    %38 = arith.maximumf %37, %36 : vector<16x128xf32>
    %c1_i32_16 = arith.constant 1 : i32
    %39 = tpu.dynamic_rotate %38 by %c1_i32_16 dim 1 : vector<16x128xf32>, i32 -> vector<16x128xf32>
    %cst_17 = arith.constant 0xFF800000 : f32
    %40 = vector.broadcast %cst_17 : f32 to vector<16x128xf32>
    %41 = arith.select %11, %39, %40 : vector<16x128xi1>, vector<16x128xf32>
    %c127_i32_18 = arith.constant 127 : i32
    %42 = tpu.dynamic_rotate %38 by %c127_i32_18 dim 1 : vector<16x128xf32>, i32 -> vector<16x128xf32>
    %cst_19 = arith.constant 0xFF800000 : f32
    %43 = vector.broadcast %cst_19 : f32 to vector<16x128xf32>
    %44 = arith.select %13, %42, %43 : vector<16x128xi1>, vector<16x128xf32>
    %45 = arith.maximumf %41, %38 : vector<16x128xf32>
    %46 = arith.maximumf %45, %44 : vector<16x128xf32>
    %47 = arith.subf %0, %46 : vector<16x128xf32>
    %cst_20 = arith.constant 0.000000e+00 : f32
    %48 = vector.broadcast %cst_20 : f32 to vector<16x128xf32>
    %49 = arith.maximumf %47, %48 : vector<16x128xf32>
    %c1_i32_21 = arith.constant 1 : i32
    %50 = tpu.dynamic_rotate %30 by %c1_i32_21 dim 0 : vector<16x128xf32>, i32 -> vector<16x128xf32>
    %cst_22 = arith.constant 0x7F800000 : f32
    %51 = vector.broadcast %cst_22 : f32 to vector<16x128xf32>
    %52 = arith.select %4, %50, %51 : vector<16x128xi1>, vector<16x128xf32>
    %c15_i32_23 = arith.constant 15 : i32
    %53 = tpu.dynamic_rotate %30 by %c15_i32_23 dim 0 : vector<16x128xf32>, i32 -> vector<16x128xf32>
    %cst_24 = arith.constant 0x7F800000 : f32
    %54 = vector.broadcast %cst_24 : f32 to vector<16x128xf32>
    %55 = arith.select %6, %53, %54 : vector<16x128xi1>, vector<16x128xf32>
    %56 = arith.minimumf %52, %30 : vector<16x128xf32>
    %57 = arith.minimumf %56, %55 : vector<16x128xf32>
    %c1_i32_25 = arith.constant 1 : i32
    %58 = tpu.dynamic_rotate %30 by %c1_i32_25 dim 1 : vector<16x128xf32>, i32 -> vector<16x128xf32>
    %cst_26 = arith.constant 0x7F800000 : f32
    %59 = vector.broadcast %cst_26 : f32 to vector<16x128xf32>
    %60 = arith.select %11, %58, %59 : vector<16x128xi1>, vector<16x128xf32>
    %c127_i32_27 = arith.constant 127 : i32
    %61 = tpu.dynamic_rotate %30 by %c127_i32_27 dim 1 : vector<16x128xf32>, i32 -> vector<16x128xf32>
    %cst_28 = arith.constant 0x7F800000 : f32
    %62 = vector.broadcast %cst_28 : f32 to vector<16x128xf32>
    %63 = arith.select %13, %61, %62 : vector<16x128xi1>, vector<16x128xf32>
    %64 = arith.minimumf %60, %30 : vector<16x128xf32>
    %65 = arith.minimumf %64, %63 : vector<16x128xf32>
    %66 = arith.minimumf %57, %65 : vector<16x128xf32>
    %c1_i32_29 = arith.constant 1 : i32
    %67 = tpu.dynamic_rotate %66 by %c1_i32_29 dim 0 : vector<16x128xf32>, i32 -> vector<16x128xf32>
    %cst_30 = arith.constant 0xFF800000 : f32
    %68 = vector.broadcast %cst_30 : f32 to vector<16x128xf32>
    %69 = arith.select %4, %67, %68 : vector<16x128xi1>, vector<16x128xf32>
    %c15_i32_31 = arith.constant 15 : i32
    %70 = tpu.dynamic_rotate %66 by %c15_i32_31 dim 0 : vector<16x128xf32>, i32 -> vector<16x128xf32>
    %cst_32 = arith.constant 0xFF800000 : f32
    %71 = vector.broadcast %cst_32 : f32 to vector<16x128xf32>
    %72 = arith.select %6, %70, %71 : vector<16x128xi1>, vector<16x128xf32>
    %73 = arith.maximumf %69, %66 : vector<16x128xf32>
    %74 = arith.maximumf %73, %72 : vector<16x128xf32>
    %c1_i32_33 = arith.constant 1 : i32
    %75 = tpu.dynamic_rotate %74 by %c1_i32_33 dim 1 : vector<16x128xf32>, i32 -> vector<16x128xf32>
    %cst_34 = arith.constant 0xFF800000 : f32
    %76 = vector.broadcast %cst_34 : f32 to vector<16x128xf32>
    %77 = arith.select %11, %75, %76 : vector<16x128xi1>, vector<16x128xf32>
    %c127_i32_35 = arith.constant 127 : i32
    %78 = tpu.dynamic_rotate %74 by %c127_i32_35 dim 1 : vector<16x128xf32>, i32 -> vector<16x128xf32>
    %cst_36 = arith.constant 0xFF800000 : f32
    %79 = vector.broadcast %cst_36 : f32 to vector<16x128xf32>
    %80 = arith.select %13, %78, %79 : vector<16x128xi1>, vector<16x128xf32>
    %81 = arith.maximumf %77, %74 : vector<16x128xf32>
    %82 = arith.maximumf %81, %80 : vector<16x128xf32>
    %83 = arith.subf %30, %82 : vector<16x128xf32>
    %cst_37 = arith.constant 0.000000e+00 : f32
    %84 = vector.broadcast %cst_37 : f32 to vector<16x128xf32>
    %85 = arith.maximumf %83, %84 : vector<16x128xf32>
    %86 = arith.mulf %49, %85 : vector<16x128xf32>
    %87 = arith.subf %85, %86 : vector<16x128xf32>
    %cst_38 = arith.constant 0.000000e+00 : f32
    %88 = vector.broadcast %cst_38 : f32 to vector<16x128xf32>
    %89 = arith.maximumf %87, %88 : vector<16x128xf32>
    %90 = arith.addf %49, %89 : vector<16x128xf32>
    %c1_i32_39 = arith.constant 1 : i32
    %91 = tpu.dynamic_rotate %66 by %c1_i32_39 dim 0 : vector<16x128xf32>, i32 -> vector<16x128xf32>
    %cst_40 = arith.constant 0x7F800000 : f32
    %92 = vector.broadcast %cst_40 : f32 to vector<16x128xf32>
    %93 = arith.select %4, %91, %92 : vector<16x128xi1>, vector<16x128xf32>
    %c15_i32_41 = arith.constant 15 : i32
    %94 = tpu.dynamic_rotate %66 by %c15_i32_41 dim 0 : vector<16x128xf32>, i32 -> vector<16x128xf32>
    %cst_42 = arith.constant 0x7F800000 : f32
    %95 = vector.broadcast %cst_42 : f32 to vector<16x128xf32>
    %96 = arith.select %6, %94, %95 : vector<16x128xi1>, vector<16x128xf32>
    %97 = arith.minimumf %93, %66 : vector<16x128xf32>
    %98 = arith.minimumf %97, %96 : vector<16x128xf32>
    %c1_i32_43 = arith.constant 1 : i32
    %99 = tpu.dynamic_rotate %66 by %c1_i32_43 dim 1 : vector<16x128xf32>, i32 -> vector<16x128xf32>
    %cst_44 = arith.constant 0x7F800000 : f32
    %100 = vector.broadcast %cst_44 : f32 to vector<16x128xf32>
    %101 = arith.select %11, %99, %100 : vector<16x128xi1>, vector<16x128xf32>
    %c127_i32_45 = arith.constant 127 : i32
    %102 = tpu.dynamic_rotate %66 by %c127_i32_45 dim 1 : vector<16x128xf32>, i32 -> vector<16x128xf32>
    %cst_46 = arith.constant 0x7F800000 : f32
    %103 = vector.broadcast %cst_46 : f32 to vector<16x128xf32>
    %104 = arith.select %13, %102, %103 : vector<16x128xi1>, vector<16x128xf32>
    %105 = arith.minimumf %101, %66 : vector<16x128xf32>
    %106 = arith.minimumf %105, %104 : vector<16x128xf32>
    %107 = arith.minimumf %98, %106 : vector<16x128xf32>
    %c1_i32_47 = arith.constant 1 : i32
    %108 = tpu.dynamic_rotate %107 by %c1_i32_47 dim 0 : vector<16x128xf32>, i32 -> vector<16x128xf32>
    %cst_48 = arith.constant 0xFF800000 : f32
    %109 = vector.broadcast %cst_48 : f32 to vector<16x128xf32>
    %110 = arith.select %4, %108, %109 : vector<16x128xi1>, vector<16x128xf32>
    %c15_i32_49 = arith.constant 15 : i32
    %111 = tpu.dynamic_rotate %107 by %c15_i32_49 dim 0 : vector<16x128xf32>, i32 -> vector<16x128xf32>
    %cst_50 = arith.constant 0xFF800000 : f32
    %112 = vector.broadcast %cst_50 : f32 to vector<16x128xf32>
    %113 = arith.select %6, %111, %112 : vector<16x128xi1>, vector<16x128xf32>
    %114 = arith.maximumf %110, %107 : vector<16x128xf32>
    %115 = arith.maximumf %114, %113 : vector<16x128xf32>
    %c1_i32_51 = arith.constant 1 : i32
    %116 = tpu.dynamic_rotate %115 by %c1_i32_51 dim 1 : vector<16x128xf32>, i32 -> vector<16x128xf32>
    %cst_52 = arith.constant 0xFF800000 : f32
    %117 = vector.broadcast %cst_52 : f32 to vector<16x128xf32>
    %118 = arith.select %11, %116, %117 : vector<16x128xi1>, vector<16x128xf32>
    %c127_i32_53 = arith.constant 127 : i32
    %119 = tpu.dynamic_rotate %115 by %c127_i32_53 dim 1 : vector<16x128xf32>, i32 -> vector<16x128xf32>
    %cst_54 = arith.constant 0xFF800000 : f32
    %120 = vector.broadcast %cst_54 : f32 to vector<16x128xf32>
    %121 = arith.select %13, %119, %120 : vector<16x128xi1>, vector<16x128xf32>
    %122 = arith.maximumf %118, %115 : vector<16x128xf32>
    %123 = arith.maximumf %122, %121 : vector<16x128xf32>
    %124 = arith.subf %66, %123 : vector<16x128xf32>
    %cst_55 = arith.constant 0.000000e+00 : f32
    %125 = vector.broadcast %cst_55 : f32 to vector<16x128xf32>
    %126 = arith.maximumf %124, %125 : vector<16x128xf32>
    %127 = arith.mulf %90, %126 : vector<16x128xf32>
    %128 = arith.subf %126, %127 : vector<16x128xf32>
    %cst_56 = arith.constant 0.000000e+00 : f32
    %129 = vector.broadcast %cst_56 : f32 to vector<16x128xf32>
    %130 = arith.maximumf %128, %129 : vector<16x128xf32>
    %131 = arith.addf %90, %130 : vector<16x128xf32>
    %c1_i32_57 = arith.constant 1 : i32
    %132 = tpu.dynamic_rotate %107 by %c1_i32_57 dim 0 : vector<16x128xf32>, i32 -> vector<16x128xf32>
    %cst_58 = arith.constant 0x7F800000 : f32
    %133 = vector.broadcast %cst_58 : f32 to vector<16x128xf32>
    %134 = arith.select %4, %132, %133 : vector<16x128xi1>, vector<16x128xf32>
    %c15_i32_59 = arith.constant 15 : i32
    %135 = tpu.dynamic_rotate %107 by %c15_i32_59 dim 0 : vector<16x128xf32>, i32 -> vector<16x128xf32>
    %cst_60 = arith.constant 0x7F800000 : f32
    %136 = vector.broadcast %cst_60 : f32 to vector<16x128xf32>
    %137 = arith.select %6, %135, %136 : vector<16x128xi1>, vector<16x128xf32>
    %138 = arith.minimumf %134, %107 : vector<16x128xf32>
    %139 = arith.minimumf %138, %137 : vector<16x128xf32>
    %c1_i32_61 = arith.constant 1 : i32
    %140 = tpu.dynamic_rotate %107 by %c1_i32_61 dim 1 : vector<16x128xf32>, i32 -> vector<16x128xf32>
    %cst_62 = arith.constant 0x7F800000 : f32
    %141 = vector.broadcast %cst_62 : f32 to vector<16x128xf32>
    %142 = arith.select %11, %140, %141 : vector<16x128xi1>, vector<16x128xf32>
    %c127_i32_63 = arith.constant 127 : i32
    %143 = tpu.dynamic_rotate %107 by %c127_i32_63 dim 1 : vector<16x128xf32>, i32 -> vector<16x128xf32>
    %cst_64 = arith.constant 0x7F800000 : f32
    %144 = vector.broadcast %cst_64 : f32 to vector<16x128xf32>
    %145 = arith.select %13, %143, %144 : vector<16x128xi1>, vector<16x128xf32>
    %146 = arith.minimumf %142, %107 : vector<16x128xf32>
    %147 = arith.minimumf %146, %145 : vector<16x128xf32>
    %148 = arith.minimumf %139, %147 : vector<16x128xf32>
    %c1_i32_65 = arith.constant 1 : i32
    %149 = tpu.dynamic_rotate %148 by %c1_i32_65 dim 0 : vector<16x128xf32>, i32 -> vector<16x128xf32>
    %cst_66 = arith.constant 0xFF800000 : f32
    %150 = vector.broadcast %cst_66 : f32 to vector<16x128xf32>
    %151 = arith.select %4, %149, %150 : vector<16x128xi1>, vector<16x128xf32>
    %c15_i32_67 = arith.constant 15 : i32
    %152 = tpu.dynamic_rotate %148 by %c15_i32_67 dim 0 : vector<16x128xf32>, i32 -> vector<16x128xf32>
    %cst_68 = arith.constant 0xFF800000 : f32
    %153 = vector.broadcast %cst_68 : f32 to vector<16x128xf32>
    %154 = arith.select %6, %152, %153 : vector<16x128xi1>, vector<16x128xf32>
    %155 = arith.maximumf %151, %148 : vector<16x128xf32>
    %156 = arith.maximumf %155, %154 : vector<16x128xf32>
    %c1_i32_69 = arith.constant 1 : i32
    %157 = tpu.dynamic_rotate %156 by %c1_i32_69 dim 1 : vector<16x128xf32>, i32 -> vector<16x128xf32>
    %cst_70 = arith.constant 0xFF800000 : f32
    %158 = vector.broadcast %cst_70 : f32 to vector<16x128xf32>
    %159 = arith.select %11, %157, %158 : vector<16x128xi1>, vector<16x128xf32>
    %c127_i32_71 = arith.constant 127 : i32
    %160 = tpu.dynamic_rotate %156 by %c127_i32_71 dim 1 : vector<16x128xf32>, i32 -> vector<16x128xf32>
    %cst_72 = arith.constant 0xFF800000 : f32
    %161 = vector.broadcast %cst_72 : f32 to vector<16x128xf32>
    %162 = arith.select %13, %160, %161 : vector<16x128xi1>, vector<16x128xf32>
    %163 = arith.maximumf %159, %156 : vector<16x128xf32>
    %164 = arith.maximumf %163, %162 : vector<16x128xf32>
    %165 = arith.subf %107, %164 : vector<16x128xf32>
    %cst_73 = arith.constant 0.000000e+00 : f32
    %166 = vector.broadcast %cst_73 : f32 to vector<16x128xf32>
    %167 = arith.maximumf %165, %166 : vector<16x128xf32>
    %168 = arith.mulf %131, %167 : vector<16x128xf32>
    %169 = arith.subf %167, %168 : vector<16x128xf32>
    %cst_74 = arith.constant 0.000000e+00 : f32
    %170 = vector.broadcast %cst_74 : f32 to vector<16x128xf32>
    %171 = arith.maximumf %169, %170 : vector<16x128xf32>
    %172 = arith.addf %131, %171 : vector<16x128xf32>
    %c1_i32_75 = arith.constant 1 : i32
    %173 = tpu.dynamic_rotate %1 by %c1_i32_75 dim 0 : vector<16x128xf32>, i32 -> vector<16x128xf32>
    %cst_76 = arith.constant 0x7F800000 : f32
    %174 = vector.broadcast %cst_76 : f32 to vector<16x128xf32>
    %175 = arith.select %4, %173, %174 : vector<16x128xi1>, vector<16x128xf32>
    %c15_i32_77 = arith.constant 15 : i32
    %176 = tpu.dynamic_rotate %1 by %c15_i32_77 dim 0 : vector<16x128xf32>, i32 -> vector<16x128xf32>
    %cst_78 = arith.constant 0x7F800000 : f32
    %177 = vector.broadcast %cst_78 : f32 to vector<16x128xf32>
    %178 = arith.select %6, %176, %177 : vector<16x128xi1>, vector<16x128xf32>
    %179 = arith.minimumf %175, %1 : vector<16x128xf32>
    %180 = arith.minimumf %179, %178 : vector<16x128xf32>
    %c1_i32_79 = arith.constant 1 : i32
    %181 = tpu.dynamic_rotate %1 by %c1_i32_79 dim 1 : vector<16x128xf32>, i32 -> vector<16x128xf32>
    %cst_80 = arith.constant 0x7F800000 : f32
    %182 = vector.broadcast %cst_80 : f32 to vector<16x128xf32>
    %183 = arith.select %11, %181, %182 : vector<16x128xi1>, vector<16x128xf32>
    %c127_i32_81 = arith.constant 127 : i32
    %184 = tpu.dynamic_rotate %1 by %c127_i32_81 dim 1 : vector<16x128xf32>, i32 -> vector<16x128xf32>
    %cst_82 = arith.constant 0x7F800000 : f32
    %185 = vector.broadcast %cst_82 : f32 to vector<16x128xf32>
    %186 = arith.select %13, %184, %185 : vector<16x128xi1>, vector<16x128xf32>
    %187 = arith.minimumf %183, %1 : vector<16x128xf32>
    %188 = arith.minimumf %187, %186 : vector<16x128xf32>
    %189 = arith.minimumf %180, %188 : vector<16x128xf32>
    %c1_i32_83 = arith.constant 1 : i32
    %190 = tpu.dynamic_rotate %189 by %c1_i32_83 dim 0 : vector<16x128xf32>, i32 -> vector<16x128xf32>
    %cst_84 = arith.constant 0xFF800000 : f32
    %191 = vector.broadcast %cst_84 : f32 to vector<16x128xf32>
    %192 = arith.select %4, %190, %191 : vector<16x128xi1>, vector<16x128xf32>
    %c15_i32_85 = arith.constant 15 : i32
    %193 = tpu.dynamic_rotate %189 by %c15_i32_85 dim 0 : vector<16x128xf32>, i32 -> vector<16x128xf32>
    %cst_86 = arith.constant 0xFF800000 : f32
    %194 = vector.broadcast %cst_86 : f32 to vector<16x128xf32>
    %195 = arith.select %6, %193, %194 : vector<16x128xi1>, vector<16x128xf32>
    %196 = arith.maximumf %192, %189 : vector<16x128xf32>
    %197 = arith.maximumf %196, %195 : vector<16x128xf32>
    %c1_i32_87 = arith.constant 1 : i32
    %198 = tpu.dynamic_rotate %197 by %c1_i32_87 dim 1 : vector<16x128xf32>, i32 -> vector<16x128xf32>
    %cst_88 = arith.constant 0xFF800000 : f32
    %199 = vector.broadcast %cst_88 : f32 to vector<16x128xf32>
    %200 = arith.select %11, %198, %199 : vector<16x128xi1>, vector<16x128xf32>
    %c127_i32_89 = arith.constant 127 : i32
    %201 = tpu.dynamic_rotate %197 by %c127_i32_89 dim 1 : vector<16x128xf32>, i32 -> vector<16x128xf32>
    %cst_90 = arith.constant 0xFF800000 : f32
    %202 = vector.broadcast %cst_90 : f32 to vector<16x128xf32>
    %203 = arith.select %13, %201, %202 : vector<16x128xi1>, vector<16x128xf32>
    %204 = arith.maximumf %200, %197 : vector<16x128xf32>
    %205 = arith.maximumf %204, %203 : vector<16x128xf32>
    %206 = arith.subf %1, %205 : vector<16x128xf32>
    %cst_91 = arith.constant 0.000000e+00 : f32
    %207 = vector.broadcast %cst_91 : f32 to vector<16x128xf32>
    %208 = arith.maximumf %206, %207 : vector<16x128xf32>
    %c1_i32_92 = arith.constant 1 : i32
    %209 = tpu.dynamic_rotate %189 by %c1_i32_92 dim 0 : vector<16x128xf32>, i32 -> vector<16x128xf32>
    %cst_93 = arith.constant 0x7F800000 : f32
    %210 = vector.broadcast %cst_93 : f32 to vector<16x128xf32>
    %211 = arith.select %4, %209, %210 : vector<16x128xi1>, vector<16x128xf32>
    %c15_i32_94 = arith.constant 15 : i32
    %212 = tpu.dynamic_rotate %189 by %c15_i32_94 dim 0 : vector<16x128xf32>, i32 -> vector<16x128xf32>
    %cst_95 = arith.constant 0x7F800000 : f32
    %213 = vector.broadcast %cst_95 : f32 to vector<16x128xf32>
    %214 = arith.select %6, %212, %213 : vector<16x128xi1>, vector<16x128xf32>
    %215 = arith.minimumf %211, %189 : vector<16x128xf32>
    %216 = arith.minimumf %215, %214 : vector<16x128xf32>
    %c1_i32_96 = arith.constant 1 : i32
    %217 = tpu.dynamic_rotate %189 by %c1_i32_96 dim 1 : vector<16x128xf32>, i32 -> vector<16x128xf32>
    %cst_97 = arith.constant 0x7F800000 : f32
    %218 = vector.broadcast %cst_97 : f32 to vector<16x128xf32>
    %219 = arith.select %11, %217, %218 : vector<16x128xi1>, vector<16x128xf32>
    %c127_i32_98 = arith.constant 127 : i32
    %220 = tpu.dynamic_rotate %189 by %c127_i32_98 dim 1 : vector<16x128xf32>, i32 -> vector<16x128xf32>
    %cst_99 = arith.constant 0x7F800000 : f32
    %221 = vector.broadcast %cst_99 : f32 to vector<16x128xf32>
    %222 = arith.select %13, %220, %221 : vector<16x128xi1>, vector<16x128xf32>
    %223 = arith.minimumf %219, %189 : vector<16x128xf32>
    %224 = arith.minimumf %223, %222 : vector<16x128xf32>
    %225 = arith.minimumf %216, %224 : vector<16x128xf32>
    %c1_i32_100 = arith.constant 1 : i32
    %226 = tpu.dynamic_rotate %225 by %c1_i32_100 dim 0 : vector<16x128xf32>, i32 -> vector<16x128xf32>
    %cst_101 = arith.constant 0xFF800000 : f32
    %227 = vector.broadcast %cst_101 : f32 to vector<16x128xf32>
    %228 = arith.select %4, %226, %227 : vector<16x128xi1>, vector<16x128xf32>
    %c15_i32_102 = arith.constant 15 : i32
    %229 = tpu.dynamic_rotate %225 by %c15_i32_102 dim 0 : vector<16x128xf32>, i32 -> vector<16x128xf32>
    %cst_103 = arith.constant 0xFF800000 : f32
    %230 = vector.broadcast %cst_103 : f32 to vector<16x128xf32>
    %231 = arith.select %6, %229, %230 : vector<16x128xi1>, vector<16x128xf32>
    %232 = arith.maximumf %228, %225 : vector<16x128xf32>
    %233 = arith.maximumf %232, %231 : vector<16x128xf32>
    %c1_i32_104 = arith.constant 1 : i32
    %234 = tpu.dynamic_rotate %233 by %c1_i32_104 dim 1 : vector<16x128xf32>, i32 -> vector<16x128xf32>
    %cst_105 = arith.constant 0xFF800000 : f32
    %235 = vector.broadcast %cst_105 : f32 to vector<16x128xf32>
    %236 = arith.select %11, %234, %235 : vector<16x128xi1>, vector<16x128xf32>
    %c127_i32_106 = arith.constant 127 : i32
    %237 = tpu.dynamic_rotate %233 by %c127_i32_106 dim 1 : vector<16x128xf32>, i32 -> vector<16x128xf32>
    %cst_107 = arith.constant 0xFF800000 : f32
    %238 = vector.broadcast %cst_107 : f32 to vector<16x128xf32>
    %239 = arith.select %13, %237, %238 : vector<16x128xi1>, vector<16x128xf32>
    %240 = arith.maximumf %236, %233 : vector<16x128xf32>
    %241 = arith.maximumf %240, %239 : vector<16x128xf32>
    %242 = arith.subf %189, %241 : vector<16x128xf32>
    %cst_108 = arith.constant 0.000000e+00 : f32
    %243 = vector.broadcast %cst_108 : f32 to vector<16x128xf32>
    %244 = arith.maximumf %242, %243 : vector<16x128xf32>
    %245 = arith.mulf %208, %244 : vector<16x128xf32>
    %246 = arith.subf %244, %245 : vector<16x128xf32>
    %cst_109 = arith.constant 0.000000e+00 : f32
    %247 = vector.broadcast %cst_109 : f32 to vector<16x128xf32>
    %248 = arith.maximumf %246, %247 : vector<16x128xf32>
    %249 = arith.addf %208, %248 : vector<16x128xf32>
    %c1_i32_110 = arith.constant 1 : i32
    %250 = tpu.dynamic_rotate %225 by %c1_i32_110 dim 0 : vector<16x128xf32>, i32 -> vector<16x128xf32>
    %cst_111 = arith.constant 0x7F800000 : f32
    %251 = vector.broadcast %cst_111 : f32 to vector<16x128xf32>
    %252 = arith.select %4, %250, %251 : vector<16x128xi1>, vector<16x128xf32>
    %c15_i32_112 = arith.constant 15 : i32
    %253 = tpu.dynamic_rotate %225 by %c15_i32_112 dim 0 : vector<16x128xf32>, i32 -> vector<16x128xf32>
    %cst_113 = arith.constant 0x7F800000 : f32
    %254 = vector.broadcast %cst_113 : f32 to vector<16x128xf32>
    %255 = arith.select %6, %253, %254 : vector<16x128xi1>, vector<16x128xf32>
    %256 = arith.minimumf %252, %225 : vector<16x128xf32>
    %257 = arith.minimumf %256, %255 : vector<16x128xf32>
    %c1_i32_114 = arith.constant 1 : i32
    %258 = tpu.dynamic_rotate %225 by %c1_i32_114 dim 1 : vector<16x128xf32>, i32 -> vector<16x128xf32>
    %cst_115 = arith.constant 0x7F800000 : f32
    %259 = vector.broadcast %cst_115 : f32 to vector<16x128xf32>
    %260 = arith.select %11, %258, %259 : vector<16x128xi1>, vector<16x128xf32>
    %c127_i32_116 = arith.constant 127 : i32
    %261 = tpu.dynamic_rotate %225 by %c127_i32_116 dim 1 : vector<16x128xf32>, i32 -> vector<16x128xf32>
    %cst_117 = arith.constant 0x7F800000 : f32
    %262 = vector.broadcast %cst_117 : f32 to vector<16x128xf32>
    %263 = arith.select %13, %261, %262 : vector<16x128xi1>, vector<16x128xf32>
    %264 = arith.minimumf %260, %225 : vector<16x128xf32>
    %265 = arith.minimumf %264, %263 : vector<16x128xf32>
    %266 = arith.minimumf %257, %265 : vector<16x128xf32>
    %c1_i32_118 = arith.constant 1 : i32
    %267 = tpu.dynamic_rotate %266 by %c1_i32_118 dim 0 : vector<16x128xf32>, i32 -> vector<16x128xf32>
    %cst_119 = arith.constant 0xFF800000 : f32
    %268 = vector.broadcast %cst_119 : f32 to vector<16x128xf32>
    %269 = arith.select %4, %267, %268 : vector<16x128xi1>, vector<16x128xf32>
    %c15_i32_120 = arith.constant 15 : i32
    %270 = tpu.dynamic_rotate %266 by %c15_i32_120 dim 0 : vector<16x128xf32>, i32 -> vector<16x128xf32>
    %cst_121 = arith.constant 0xFF800000 : f32
    %271 = vector.broadcast %cst_121 : f32 to vector<16x128xf32>
    %272 = arith.select %6, %270, %271 : vector<16x128xi1>, vector<16x128xf32>
    %273 = arith.maximumf %269, %266 : vector<16x128xf32>
    %274 = arith.maximumf %273, %272 : vector<16x128xf32>
    %c1_i32_122 = arith.constant 1 : i32
    %275 = tpu.dynamic_rotate %274 by %c1_i32_122 dim 1 : vector<16x128xf32>, i32 -> vector<16x128xf32>
    %cst_123 = arith.constant 0xFF800000 : f32
    %276 = vector.broadcast %cst_123 : f32 to vector<16x128xf32>
    %277 = arith.select %11, %275, %276 : vector<16x128xi1>, vector<16x128xf32>
    %c127_i32_124 = arith.constant 127 : i32
    %278 = tpu.dynamic_rotate %274 by %c127_i32_124 dim 1 : vector<16x128xf32>, i32 -> vector<16x128xf32>
    %cst_125 = arith.constant 0xFF800000 : f32
    %279 = vector.broadcast %cst_125 : f32 to vector<16x128xf32>
    %280 = arith.select %13, %278, %279 : vector<16x128xi1>, vector<16x128xf32>
    %281 = arith.maximumf %277, %274 : vector<16x128xf32>
    %282 = arith.maximumf %281, %280 : vector<16x128xf32>
    %283 = arith.subf %225, %282 : vector<16x128xf32>
    %cst_126 = arith.constant 0.000000e+00 : f32
    %284 = vector.broadcast %cst_126 : f32 to vector<16x128xf32>
    %285 = arith.maximumf %283, %284 : vector<16x128xf32>
    %286 = arith.mulf %249, %285 : vector<16x128xf32>
    %287 = arith.subf %285, %286 : vector<16x128xf32>
    %cst_127 = arith.constant 0.000000e+00 : f32
    %288 = vector.broadcast %cst_127 : f32 to vector<16x128xf32>
    %289 = arith.maximumf %287, %288 : vector<16x128xf32>
    %290 = arith.addf %249, %289 : vector<16x128xf32>
    %c1_i32_128 = arith.constant 1 : i32
    %291 = tpu.dynamic_rotate %266 by %c1_i32_128 dim 0 : vector<16x128xf32>, i32 -> vector<16x128xf32>
    %cst_129 = arith.constant 0x7F800000 : f32
    %292 = vector.broadcast %cst_129 : f32 to vector<16x128xf32>
    %293 = arith.select %4, %291, %292 : vector<16x128xi1>, vector<16x128xf32>
    %c15_i32_130 = arith.constant 15 : i32
    %294 = tpu.dynamic_rotate %266 by %c15_i32_130 dim 0 : vector<16x128xf32>, i32 -> vector<16x128xf32>
    %cst_131 = arith.constant 0x7F800000 : f32
    %295 = vector.broadcast %cst_131 : f32 to vector<16x128xf32>
    %296 = arith.select %6, %294, %295 : vector<16x128xi1>, vector<16x128xf32>
    %297 = arith.minimumf %293, %266 : vector<16x128xf32>
    %298 = arith.minimumf %297, %296 : vector<16x128xf32>
    %c1_i32_132 = arith.constant 1 : i32
    %299 = tpu.dynamic_rotate %266 by %c1_i32_132 dim 1 : vector<16x128xf32>, i32 -> vector<16x128xf32>
    %cst_133 = arith.constant 0x7F800000 : f32
    %300 = vector.broadcast %cst_133 : f32 to vector<16x128xf32>
    %301 = arith.select %11, %299, %300 : vector<16x128xi1>, vector<16x128xf32>
    %c127_i32_134 = arith.constant 127 : i32
    %302 = tpu.dynamic_rotate %266 by %c127_i32_134 dim 1 : vector<16x128xf32>, i32 -> vector<16x128xf32>
    %cst_135 = arith.constant 0x7F800000 : f32
    %303 = vector.broadcast %cst_135 : f32 to vector<16x128xf32>
    %304 = arith.select %13, %302, %303 : vector<16x128xi1>, vector<16x128xf32>
    %305 = arith.minimumf %301, %266 : vector<16x128xf32>
    %306 = arith.minimumf %305, %304 : vector<16x128xf32>
    %307 = arith.minimumf %298, %306 : vector<16x128xf32>
    %c1_i32_136 = arith.constant 1 : i32
    %308 = tpu.dynamic_rotate %307 by %c1_i32_136 dim 0 : vector<16x128xf32>, i32 -> vector<16x128xf32>
    %cst_137 = arith.constant 0xFF800000 : f32
    %309 = vector.broadcast %cst_137 : f32 to vector<16x128xf32>
    %310 = arith.select %4, %308, %309 : vector<16x128xi1>, vector<16x128xf32>
    %c15_i32_138 = arith.constant 15 : i32
    %311 = tpu.dynamic_rotate %307 by %c15_i32_138 dim 0 : vector<16x128xf32>, i32 -> vector<16x128xf32>
    %cst_139 = arith.constant 0xFF800000 : f32
    %312 = vector.broadcast %cst_139 : f32 to vector<16x128xf32>
    %313 = arith.select %6, %311, %312 : vector<16x128xi1>, vector<16x128xf32>
    %314 = arith.maximumf %310, %307 : vector<16x128xf32>
    %315 = arith.maximumf %314, %313 : vector<16x128xf32>
    %c1_i32_140 = arith.constant 1 : i32
    %316 = tpu.dynamic_rotate %315 by %c1_i32_140 dim 1 : vector<16x128xf32>, i32 -> vector<16x128xf32>
    %cst_141 = arith.constant 0xFF800000 : f32
    %317 = vector.broadcast %cst_141 : f32 to vector<16x128xf32>
    %318 = arith.select %11, %316, %317 : vector<16x128xi1>, vector<16x128xf32>
    %c127_i32_142 = arith.constant 127 : i32
    %319 = tpu.dynamic_rotate %315 by %c127_i32_142 dim 1 : vector<16x128xf32>, i32 -> vector<16x128xf32>
    %cst_143 = arith.constant 0xFF800000 : f32
    %320 = vector.broadcast %cst_143 : f32 to vector<16x128xf32>
    %321 = arith.select %13, %319, %320 : vector<16x128xi1>, vector<16x128xf32>
    %322 = arith.maximumf %318, %315 : vector<16x128xf32>
    %323 = arith.maximumf %322, %321 : vector<16x128xf32>
    %324 = arith.subf %266, %323 : vector<16x128xf32>
    %cst_144 = arith.constant 0.000000e+00 : f32
    %325 = vector.broadcast %cst_144 : f32 to vector<16x128xf32>
    %326 = arith.maximumf %324, %325 : vector<16x128xf32>
    %327 = arith.mulf %290, %326 : vector<16x128xf32>
    %328 = arith.subf %326, %327 : vector<16x128xf32>
    %cst_145 = arith.constant 0.000000e+00 : f32
    %329 = vector.broadcast %cst_145 : f32 to vector<16x128xf32>
    %330 = arith.maximumf %328, %329 : vector<16x128xf32>
    %331 = arith.addf %290, %330 : vector<16x128xf32>
    %332 = arith.mulf %172, %1 : vector<16x128xf32>
    %333 = vector.shape_cast %332 : vector<16x128xf32> to vector<1x16x128xf32>
    %cst_146 = arith.constant dense<0.000000e+00> : vector<1xf32>
    %334 = vector.multi_reduction <add>, %333, %cst_146 [1, 2] : vector<1x16x128xf32> to vector<1xf32>
    %335 = vector.shape_cast %334 : vector<1xf32> to vector<1x1x1xf32>
    %336 = vector.extract %335[0, 0, 0] : f32 from vector<1x1x1xf32>
    %337 = vector.broadcast %336 : f32 to vector<1x1xf32>
    %338 = vector.shape_cast %172 : vector<16x128xf32> to vector<1x16x128xf32>
    %cst_147 = arith.constant dense<0.000000e+00> : vector<1xf32>
    %339 = vector.multi_reduction <add>, %338, %cst_147 [1, 2] : vector<1x16x128xf32> to vector<1xf32>
    %340 = vector.shape_cast %339 : vector<1xf32> to vector<1x1x1xf32>
    %341 = vector.extract %340[0, 0, 0] : f32 from vector<1x1x1xf32>
    %342 = vector.broadcast %341 : f32 to vector<1x1xf32>
    %343 = arith.mulf %331, %0 : vector<16x128xf32>
    %344 = vector.shape_cast %343 : vector<16x128xf32> to vector<1x16x128xf32>
    %cst_148 = arith.constant dense<0.000000e+00> : vector<1xf32>
    %345 = vector.multi_reduction <add>, %344, %cst_148 [1, 2] : vector<1x16x128xf32> to vector<1xf32>
    %346 = vector.shape_cast %345 : vector<1xf32> to vector<1x1x1xf32>
    %347 = vector.extract %346[0, 0, 0] : f32 from vector<1x1x1xf32>
    %348 = vector.broadcast %347 : f32 to vector<1x1xf32>
    %349 = vector.shape_cast %331 : vector<16x128xf32> to vector<1x16x128xf32>
    %cst_149 = arith.constant dense<0.000000e+00> : vector<1xf32>
    %350 = vector.multi_reduction <add>, %349, %cst_149 [1, 2] : vector<1x16x128xf32> to vector<1xf32>
    %351 = vector.shape_cast %350 : vector<1xf32> to vector<1x1x1xf32>
    %352 = vector.extract %351[0, 0, 0] : f32 from vector<1x1x1xf32>
    %353 = vector.broadcast %352 : f32 to vector<1x1xf32>
    %354 = tpu.iota {dimensions = array<i32: 0>} : vector<8x128xi32>
    %c0_i32 = arith.constant 0 : i32
    %355 = vector.broadcast %c0_i32 : i32 to vector<8x128xi32>
    %356 = arith.cmpi eq, %354, %355 : vector<8x128xi32>
    %c1_i32_150 = arith.constant 1 : i32
    %357 = vector.broadcast %c1_i32_150 : i32 to vector<8x128xi32>
    %358 = arith.cmpi eq, %354, %357 : vector<8x128xi32>
    %c2_i32 = arith.constant 2 : i32
    %359 = vector.broadcast %c2_i32 : i32 to vector<8x128xi32>
    %360 = arith.cmpi eq, %354, %359 : vector<8x128xi32>
    %361 = vector.shape_cast %348 : vector<1x1xf32> to vector<1x1xf32>
    %362 = vector.broadcast %361 : vector<1x1xf32> to vector<8x128xf32>
    %363 = vector.shape_cast %353 : vector<1x1xf32> to vector<1x1xf32>
    %364 = vector.broadcast %363 : vector<1x1xf32> to vector<8x128xf32>
    %365 = arith.select %360, %362, %364 : vector<8x128xi1>, vector<8x128xf32>
    %366 = vector.shape_cast %342 : vector<1x1xf32> to vector<1x1xf32>
    %367 = vector.broadcast %366 : vector<1x1xf32> to vector<8x128xf32>
    %368 = arith.select %358, %367, %365 : vector<8x128xi1>, vector<8x128xf32>
    %369 = vector.shape_cast %337 : vector<1x1xf32> to vector<1x1xf32>
    %370 = vector.broadcast %369 : vector<1x1xf32> to vector<8x128xf32>
    %371 = arith.select %356, %370, %368 : vector<8x128xi1>, vector<8x128xf32>
    %c0_151 = arith.constant 0 : index
    %c0_152 = arith.constant 0 : index
    %c0_153 = arith.constant 0 : index
    %372 = vector.load %arg4[%c0_151, %c0_152, %c0_153] : memref<1x8x128xf32, #tpu.memory_space<vmem>>, vector<1x8x128xf32>
    %373 = vector.shape_cast %372 : vector<1x8x128xf32> to vector<8x128xf32>
    %374 = vector.shape_cast %371 : vector<8x128xf32> to vector<1x8x128xf32>
    tpu.vector_store %arg4[%c0_151, %c0_152, %c0_153], %374 {strides = array<i32>} : memref<1x8x128xf32, #tpu.memory_space<vmem>>, vector<1x8x128xf32>,
    return
  }
  func.func @transform_0(%arg0: i32) -> (i32, i32) {
    %c0_i32 = arith.constant 0 : i32
    %c0_i32_0 = arith.constant 0 : i32
    %c0_i32_1 = arith.constant 0 : i32
    return %c0_i32, %c0_i32_0 : i32, i32
  }
  func.func @transform_1(%arg0: i32) -> (i32, i32) {
    %c0_i32 = arith.constant 0 : i32
    %c0_i32_0 = arith.constant 0 : i32
    return %c0_i32, %arg0 : i32, i32
  }
  func.func @transform_2(%arg0: i32) -> (i32, i32) {
    %c0_i32 = arith.constant 0 : i32
    %c0_i32_0 = arith.constant 0 : i32
    return %c0_i32, %arg0 : i32, i32
  }
  func.func @transform_3(%arg0: i32) -> (i32, i32, i32) {
    %c0_i32 = arith.constant 0 : i32
    %c0_i32_0 = arith.constant 0 : i32
    %c0_i32_1 = arith.constant 0 : i32
    return %arg0, %c0_i32, %c0_i32_0 : i32, i32, i32
  }
}

</mosaic_0001>

<bundles_post_ra>
// kernel: tpu_custom_call.1
= control target key start
LH: loop header
LB: loop body
LE: loop exit
PB: predicated region body
PF: predicated region fallthrough
CT: control target
= control target key end

     0   :  { %8 = vsyncpa [#allocation3], 0  ;;  %s1534_s0 = inlined_call_operand.hbm [shape: s32[1,128], index: 0, kind: input, shape index: {}]   ;;  %s1535_s1 = inlined_call_operand.hbm [shape: f32[16,128], index: 1, kind: input, shape index: {}]   ;;  %s1536_s2 = inlined_call_operand.hbm [shape: f32[16,128], index: 2, kind: input, shape index: {}]   ;;  %s1537_s3 = inlined_call_operand.hbm [shape: f32[1,8,128], index: 3, kind: output, shape index: {}]  }
   0x1   :  { %9 = vsyncpa [#allocation6], 0 }
   0x2   :  { %10 = vsyncpa [#allocation4], 0  ;;  %s820_s12 = smov [#allocation5]   ;;  %s726_s16 = scalar_lea.hbm %s1535_s1, 256 }
   0x3   :  { %s26_s13 = sshll.u32 %s820_s12, 4  ;;  %p727_p0 = scmp.ne.s32.totalorder %s1535_s1, %s726_s16  ;;  %s27_s13 = int_to_ptr.vmem [resolvable:$true] %s26_s13 }
   0x4   :  { %p730_p1 = scmp.lt.u32.totalorder %s726_s16, %s1535_s1 }
   0x6   :  { %p732_p2 = pnand %p730_p1, %p727_p0 }
   0x8   :  { %735 = shalt.err (!%p732_p2)
}
   0x9   :  { %s736_s21 = scalar_lea.vmem %s27_s13, 256  ;;  %p741_p4 = scmp.lt.s32.totalorder %s27_s13, %s27_s13 }
   0xa   :  { %p737_p3 = scmp.ne.s32.totalorder %s27_s13, %s736_s21  ;;  %p742_p5 = scmp.lt.s32.totalorder %s736_s21, %s736_s21 }
   0xc   :  { %p743_p6 = por %p742_p5, %p741_p4 }
   0xe   :  { %p744_p7 = pnand %p743_p6, %p737_p3 }
  0x10   :  { %747 = shalt.err (!%p744_p7)
}
  0x11   :  { %s821_s22 = smov 128   ;;  %s822_s23 = smov 8  }
  0x12   :  { %32 = dma.hbm_to_vmem [thread:$0]  %s1535_s1, 256, %s27_s13, [#allocation6], %s821_s22, %s821_s22, %s822_s23  }
  0x13   :  { %s823_s26 = smov [#allocation2]   ;;  %s824_s28 = smov [#allocation7]  }
  0x14   :  { %s17_s27 = sshll.u32 %s823_s26, 4  ;;  %s38_s29 = sshll.u32 %s824_s28, 4  ;;  %s18_s27 = int_to_ptr.vmem [resolvable:$true] %s17_s27  ;;  %s39_s29 = int_to_ptr.vmem [resolvable:$true] %s38_s29 }
  0x15   :  { %s748_s5 = scalar_lea.hbm %s1534_s0, 16 }
  0x16   :  { %p749_p8 = scmp.ne.s32.totalorder %s1534_s0, %s748_s5  ;;  %p752_p9 = scmp.lt.u32.totalorder %s748_s5, %s1534_s0 }
  0x18   :  { %p754_p10 = pnand %p752_p9, %p749_p8 }
  0x1a   :  { %757 = shalt.err (!%p754_p10)
}
  0x1b   :  { %s758_s1 = scalar_lea.vmem %s18_s27, 16  ;;  %s762_s10 = scalar_lea.vmem %s18_s27, 32 }
  0x1c   :  { %p759_p11 = scmp.ne.s32.totalorder %s18_s27, %s758_s1  ;;  %p763_p12 = scmp.lt.s32.totalorder %s18_s27, %s18_s27 }
  0x1d   :  { %p764_p13 = scmp.lt.s32.totalorder %s762_s10, %s758_s1 }
  0x1f   :  { %p765_p0 = por %p764_p13, %p763_p12 }
  0x21   :  { %p766_p1 = pnand %p765_p0, %p759_p11 }
  0x23   :  { %769 = shalt.err (!%p766_p1)
}
  0x24   :  { %20 = dma.hbm_to_vmem [thread:$0]  %s1534_s0, 16, %s18_s27, [#allocation3]  }
  0x25   :  { %s770_s15 = scalar_lea.hbm %s1536_s2, 256 }
  0x26   :  { %p771_p2 = scmp.ne.s32.totalorder %s1536_s2, %s770_s15  ;;  %p774_p3 = scmp.lt.u32.totalorder %s770_s15, %s1536_s2 }
  0x28   :  { %p776_p4 = pnand %p774_p3, %p771_p2 }
  0x2a   :  { %779 = shalt.err (!%p776_p4)
}
  0x2b   :  { %s780_s20 = scalar_lea.vmem %s39_s29, 256  ;;  %p785_p6 = scmp.lt.s32.totalorder %s39_s29, %s39_s29 }
  0x2c   :  { %p781_p5 = scmp.ne.s32.totalorder %s39_s29, %s780_s20  ;;  %p786_p7 = scmp.lt.s32.totalorder %s780_s20, %s780_s20 }
  0x2e   :  { %p787_p8 = por %p786_p7, %p785_p6 }
  0x30   :  { %p788_p9 = pnand %p787_p8, %p781_p5 }
  0x32   :  { %791 = shalt.err (!%p788_p9)
}
  0x33   :  { %44 = dma.hbm_to_vmem [thread:$0]  %s1536_s2, 256, %s39_s29, [#allocation6], %s821_s22, %s821_s22, %s822_s23  }
  0x34   :  { %814 = dma.done.wait [#allocation3], 16  }
  0x35   :  { %815 = vsyncadd [#allocation3], 4294967280 }
  0x36   :  { %816 = dma.done.wait [#allocation6], 512  }
  0x37   :  { %817 = vsyncadd [#allocation6], 4294966784  ;;  %v890_v0 = vld [vmem:[#allocation7] sm:$0xff]  ;;  %v892_v1 = vld [vmem:[#allocation5] sm:$0xff]  ;;  %s825_s24 = smov 1   ;;  %s826_s2 = smov 127   ;;  %v58_v4 = vlaneseq }
  0x38   :  { %370 = vrot.lane.b32.xlu1 %v890_v0, %s825_s24  ;;  %90 = vrot.lane.b32.xlu0 %v892_v1, %s825_s24  ;;  %v898_v2 = vld [vmem:[#allocation7 + $0x8] sm:$0xff]  ;;  %v900_v3 = vld [vmem:[#allocation5 + $0x8] sm:$0xff]  ;;  %v72_v6 = vrot.slane %v892_v1, 7  ;;  %v79_v9 = vrot.slane %v892_v1, 1  ;;  %v354_v11 = vrot.slane %v890_v0, 7  ;;  %v360_v19 = vrot.slane %v890_v0, 1 }
  0x39   :  { %v914_v5 = vshrl.u32 %v58_v4, 7  ;;  %v73_v7 = vrot.slane %v900_v3, 7  ;;  %v80_v10 = vrot.slane %v900_v3, 1  ;;  %v355_v12 = vrot.slane %v898_v2, 7  ;;  %v930_v14 = vld [vmem:[#allocation2] ss:$0 sm:$0xff] }
  0x3a   :  { %v361_v20 = vrot.slane %v898_v2, 1  ;;  %vm70_vm4 = vcmp.ge.s32.totalorder %v930_v14, 1  ;;  %vm71_vm5 = vcmp.le.s32.totalorder %v930_v14, 14  ;;  %s827_s27 = smov [#allocation8]  }
  0x3b   :  { %v919_v8 = vadd.s32 8, %v914_v5  ;;  %vm74_vm0 = vcmp.lt.s32.totalorder %v914_v5, 1  ;;  %vm81_vm1 = vcmp.lt.s32.totalorder %v914_v5, 7  ;;  %vm61_vm2 = vcmp.ge.s32.totalorder %v914_v5, 1  ;;  %s695_s28 = sshll.u32 %s827_s27, 4  ;;  %s696_s28 = int_to_ptr.vmem [resolvable:$true] %s695_s28 }
  0x3c   :  { %372 = vrot.lane.b32.xlu1 %v898_v2, %s825_s24  ;;  %92 = vrot.lane.b32.xlu0 %v900_v3, %s825_s24  ;;  %v76_v13 = vsel %vm74_vm0, %v73_v7, %v72_v6  ;;  %v75_v17 = vsel %vm74_vm0, %v72_v6, %v73_v7  ;;  %v83_v18 = vsel %vm81_vm1, %v80_v10, %v79_v9  ;;  %vm680_vm6 = vcmp.eq.s32.totalorder %v914_v5, 2  ;;  %s792_s29 = scalar_lea.vmem %s696_s28, 128  ;;  %p797_p11 = scmp.lt.s32.totalorder %s696_s28, %s696_s28 }
  0x3d   :  { %vm64_vm3 = vcmp.lt.s32.totalorder %v919_v8, 15  ;;  %v77_v21 = vsel %vm61_vm2, %v76_v13, inf  ;;  %v357_v22 = vsel %vm74_vm0, %v355_v12, %v354_v11  ;;  %v87_v24 = vmin.f32 %v75_v17, %v900_v3  ;;  %p793_p10 = scmp.ne.s32.totalorder %s696_s28, %s792_s29  ;;  %p798_p12 = scmp.lt.s32.totalorder %s792_s29, %s792_s29 }
  0x3e   :  { %v85_v23 = vsel %vm64_vm3, %v83_v18, inf  ;;  %v86_v27 = vmin.f32 %v77_v21, %v892_v1  ;;  %v356_v28 = vsel %vm74_vm0, %v354_v11, %v355_v12  ;;  %v363_v29 = vsel %vm81_vm1, %v361_v20, %v360_v19 }
  0x3f   :  { %v358_v30 = vsel %vm61_vm2, %v357_v22, inf  ;;  %v82_v33 = vsel %vm81_vm1, %v79_v9, %v80_v10  ;;  %v89_v34 = vmin.f32 %v87_v24, %v85_v23  ;;  %v365_v35 = vsel %vm64_vm3, %v363_v29, inf  ;;  %p799_p13 = por %p798_p12, %p797_p11 }
  0x40   :  { %98 = vrot.lane.b32.xlu1 %v900_v3, %s826_s2  ;;  %96 = vrot.lane.b32.xlu0 %v892_v1, %s826_s2  ;;  %v367_v36 = vmin.f32 %v356_v28, %v898_v2  ;;  %v366_v37 = vmin.f32 %v358_v30, %v890_v0  ;;  %v88_v42 = vmin.f32 %v86_v27, %v82_v33  ;;  %vm679_vm7 = vcmp.eq.s32.totalorder %v914_v5, 1 }
  0x41   :  { %v362_v43 = vsel %vm81_vm1, %v360_v19, %v361_v20  ;;  %vm678_vm8 = vcmp.eq.s32.totalorder %v914_v5, 0  ;;  %p800_p0 = pnand %p799_p13, %p793_p10 }
  0x42   :  { %v369_v50 = vmin.f32 %v367_v36, %v365_v35  ;;  %v368_v51 = vmin.f32 %v366_v37, %v362_v43 }
  0x44   :  { %378 = vrot.lane.b32.xlu1 %v898_v2, %s826_s2  ;;  %376 = vrot.lane.b32.xlu0 %v890_v0, %s826_s2 }
  0xaa   :  { %v371_v15 = vpop.permute.xlu1 %370  ;;  %v91_v16 = vpop.permute.xlu0 %90 }
  0xab   :  { %v94_v31 = vsel %vm70_vm4, %v91_v16, inf  ;;  %v374_v44 = vsel %vm70_vm4, %v371_v15, inf }
  0xac   :  { %v102_v38 = vmin.f32 %v94_v31, %v892_v1  ;;  %v382_v52 = vmin.f32 %v374_v44, %v890_v0 }
  0xae   :  { %v373_v25 = vpop.permute.xlu1 %372  ;;  %v93_v26 = vpop.permute.xlu0 %92 }
  0xaf   :  { %v95_v32 = vsel %vm70_vm4, %v93_v26, inf  ;;  %v375_v45 = vsel %vm70_vm4, %v373_v25, inf }
  0xb0   :  { %v103_v39 = vmin.f32 %v95_v32, %v900_v3  ;;  %v383_v53 = vmin.f32 %v375_v45, %v898_v2 }
  0xb2   :  { %v99_v40 = vpop.permute.xlu1 %98  ;;  %v97_v41 = vpop.permute.xlu0 %96 }
  0xb3   :  { %v101_v46 = vsel %vm71_vm5, %v99_v40, inf  ;;  %v100_v47 = vsel %vm71_vm5, %v97_v41, inf }
  0xb4   :  { %v105_v48 = vmin.f32 %v103_v39, %v101_v46  ;;  %v104_v49 = vmin.f32 %v102_v38, %v100_v47 }
  0xb6   :  { %v979_v54 = vmin.f32 %v89_v34, %v105_v48  ;;  %v981_v55 = vmin.f32 %v88_v42, %v104_v49  ;;  %v379_v56 = vpop.permute.xlu1 %378  ;;  %v377_v57 = vpop.permute.xlu0 %376 }
  0xb7   :  { %v381_v58 = vsel %vm71_vm5, %v379_v56, inf  ;;  %v380_v59 = vsel %vm71_vm5, %v377_v57, inf }
  0xb8   :  { %v385_v60 = vmin.f32 %v383_v53, %v381_v58  ;;  %v384_v61 = vmin.f32 %v382_v52, %v380_v59  ;;  %152 = vrot.lane.b32.xlu0 %v981_v55, %s825_s24  ;;  %154 = vrot.lane.b32.xlu1 %v979_v54, %s825_s24  ;;  %v108_v62 = vrot.slane %v981_v55, 7  ;;  %v109_v63 = vrot.slane %v979_v54, 7 }
  0xb9   :  { %v114_v4 = vrot.slane %v981_v55, 1  ;;  %v115_v6 = vrot.slane %v979_v54, 1 }
  0xba   :  { %v995_v7 = vmin.f32 %v369_v50, %v385_v60  ;;  %v997_v9 = vmin.f32 %v368_v51, %v384_v61  ;;  %v111_v10 = vsel %vm74_vm0, %v109_v63, %v108_v62  ;;  %v110_v18 = vsel %vm74_vm0, %v108_v62, %v109_v63 }
  0xbb   :  { %v117_v13 = vsel %vm81_vm1, %v115_v6, %v114_v4  ;;  %v112_v17 = vsel %vm61_vm2, %v111_v10, -inf  ;;  %v116_v21 = vsel %vm81_vm1, %v114_v4, %v115_v6  ;;  %v121_v26 = vmax.f32 %v110_v18, %v979_v54 }
  0xbc   :  { %432 = vrot.lane.b32.xlu0 %v997_v9, %s825_s24  ;;  %434 = vrot.lane.b32.xlu1 %v995_v7, %s825_s24  ;;  %v388_v11 = vrot.slane %v997_v9, 7  ;;  %v389_v12 = vrot.slane %v995_v7, 7  ;;  %v394_v15 = vrot.slane %v997_v9, 1  ;;  %v395_v16 = vrot.slane %v995_v7, 1 }
  0xbd   :  { %v120_v20 = vmax.f32 %v112_v17, %v981_v55  ;;  %v119_v25 = vsel %vm64_vm3, %v117_v13, -inf  ;;  %v144_v37 = vsel %vm61_vm2, %v111_v10, inf  ;;  %v149_v38 = vmin.f32 %v110_v18, %v979_v54 }
  0xbe   :  { %v391_v19 = vsel %vm74_vm0, %v389_v12, %v388_v11  ;;  %v390_v22 = vsel %vm74_vm0, %v388_v11, %v389_v12  ;;  %v397_v23 = vsel %vm81_vm1, %v395_v16, %v394_v15  ;;  %v396_v31 = vsel %vm81_vm1, %v394_v15, %v395_v16 }
  0xbf   :  { %v1028_v24 = vmax.f32 %v120_v20, %v116_v21  ;;  %v392_v27 = vsel %vm61_vm2, %v391_v19, -inf  ;;  %v399_v28 = vsel %vm64_vm3, %v397_v23, -inf  ;;  %v401_v30 = vmax.f32 %v390_v22, %v995_v7 }
  0xc0   :  { %158 = vrot.lane.b32.xlu0 %v981_v55, %s826_s2  ;;  %160 = vrot.lane.b32.xlu1 %v979_v54, %s826_s2  ;;  %v400_v29 = vmax.f32 %v392_v27, %v997_v9  ;;  %v1041_v32 = vmax.f32 %v121_v26, %v119_v25  ;;  %v148_v41 = vmin.f32 %v144_v37, %v981_v55  ;;  %v147_v42 = vsel %vm64_vm3, %v117_v13, inf }
  0xc1   :  { %v1049_v34 = vmax.f32 %v401_v30, %v399_v28  ;;  %v151_v45 = vmin.f32 %v149_v38, %v147_v42  ;;  %v424_v46 = vsel %vm61_vm2, %v391_v19, inf  ;;  %v429_v52 = vmin.f32 %v390_v22, %v995_v7 }
  0xc2   :  { %v1047_v33 = vmax.f32 %v400_v29, %v396_v31  ;;  %v150_v50 = vmin.f32 %v148_v41, %v116_v21  ;;  %v428_v61 = vmin.f32 %v424_v46, %v997_v9  ;;  %v427_v62 = vsel %vm64_vm3, %v397_v23, inf }
  0xc3   :  { %v431_v15 = vmin.f32 %v429_v52, %v427_v62 }
  0xc4   :  { %438 = vrot.lane.b32.xlu0 %v997_v9, %s826_s2  ;;  %440 = vrot.lane.b32.xlu1 %v995_v7, %s826_s2  ;;  %v430_v17 = vmin.f32 %v428_v61, %v396_v31 }
 0x12a   :  { %v153_v35 = vpop.permute.xlu0 %152  ;;  %v155_v36 = vpop.permute.xlu1 %154 }
 0x12b   :  { %v156_v43 = vsel %vm70_vm4, %v153_v35, inf  ;;  %v157_v44 = vsel %vm70_vm4, %v155_v36, inf }
 0x12c   :  { %v164_v47 = vmin.f32 %v156_v43, %v981_v55  ;;  %v165_v48 = vmin.f32 %v157_v44, %v979_v54 }
 0x12e   :  { %v433_v39 = vpop.permute.xlu0 %432  ;;  %v435_v40 = vpop.permute.xlu1 %434 }
 0x12f   :  { %v436_v53 = vsel %vm70_vm4, %v433_v39, inf  ;;  %v437_v56 = vsel %vm70_vm4, %v435_v40, inf }
 0x130   :  { %v444_v63 = vmin.f32 %v436_v53, %v997_v9  ;;  %v445_v4 = vmin.f32 %v437_v56, %v995_v7 }
 0x132   :  { %v159_v49 = vpop.permute.xlu0 %158  ;;  %v161_v51 = vpop.permute.xlu1 %160 }
 0x133   :  { %v162_v57 = vsel %vm71_vm5, %v159_v49, inf  ;;  %v163_v58 = vsel %vm71_vm5, %v161_v51, inf }
 0x134   :  { %v166_v59 = vmin.f32 %v164_v47, %v162_v57  ;;  %v167_v60 = vmin.f32 %v165_v48, %v163_v58 }
 0x136   :  { %v1079_v6 = vmin.f32 %v150_v50, %v166_v59  ;;  %v1081_v10 = vmin.f32 %v151_v45, %v167_v60  ;;  %v439_v11 = vpop.permute.xlu0 %438  ;;  %v441_v12 = vpop.permute.xlu1 %440 }
 0x137   :  { %v442_v13 = vsel %vm71_vm5, %v439_v11, inf  ;;  %v443_v16 = vsel %vm71_vm5, %v441_v12, inf }
 0x138   :  { %v446_v18 = vmin.f32 %v444_v63, %v442_v13  ;;  %v447_v19 = vmin.f32 %v445_v4, %v443_v16  ;;  %222 = vrot.lane.b32.xlu0 %v1079_v6, %s825_s24  ;;  %224 = vrot.lane.b32.xlu1 %v1081_v10, %s825_s24  ;;  %v170_v22 = vrot.slane %v1079_v6, 7  ;;  %v171_v23 = vrot.slane %v1081_v10, 7 }
 0x139   :  { %v176_v25 = vrot.slane %v1079_v6, 1  ;;  %v177_v26 = vrot.slane %v1081_v10, 1 }
 0x13a   :  { %v1091_v20 = vmin.f32 %v430_v17, %v446_v18  ;;  %v1093_v21 = vmin.f32 %v431_v15, %v447_v19  ;;  %v1115_v31 = vsel %vm74_vm0, %v171_v23, %v170_v22  ;;  %v1119_v35 = vsel %vm74_vm0, %v170_v22, %v171_v23 }
 0x13b   :  { %v1123_v36 = vsel %vm81_vm1, %v177_v26, %v176_v25  ;;  %v214_v38 = vsel %vm61_vm2, %v1115_v31, inf  ;;  %v219_v39 = vmin.f32 %v1119_v35, %v1081_v10  ;;  %v1153_v50 = vsel %vm81_vm1, %v176_v25, %v177_v26 }
 0x13c   :  { %502 = vrot.lane.b32.xlu0 %v1091_v20, %s825_s24  ;;  %504 = vrot.lane.b32.xlu1 %v1093_v21, %s825_s24  ;;  %v450_v27 = vrot.slane %v1091_v20, 7  ;;  %v451_v28 = vrot.slane %v1093_v21, 7  ;;  %v456_v40 = vrot.slane %v1091_v20, 1  ;;  %v457_v41 = vrot.slane %v1093_v21, 1 }
 0x13d   :  { %v217_v44 = vsel %vm64_vm3, %v1123_v36, inf  ;;  %v218_v49 = vmin.f32 %v214_v38, %v1079_v6 }
 0x13e   :  { %v1127_v37 = vsel %vm74_vm0, %v451_v28, %v450_v27  ;;  %v1148_v48 = vsel %vm74_vm0, %v450_v27, %v451_v28  ;;  %v221_v51 = vmin.f32 %v219_v39, %v217_v44  ;;  %v1157_v52 = vsel %vm81_vm1, %v457_v41, %v456_v40 }
 0x13f   :  { %v494_v47 = vsel %vm61_vm2, %v1127_v37, inf  ;;  %v499_v60 = vmin.f32 %v1148_v48, %v1093_v21  ;;  %v220_v11 = vmin.f32 %v218_v49, %v1153_v50  ;;  %v497_v15 = vsel %vm64_vm3, %v1157_v52, inf }
 0x140   :  { %228 = vrot.lane.b32.xlu0 %v1079_v6, %s826_s2  ;;  %230 = vrot.lane.b32.xlu1 %v1081_v10, %s826_s2  ;;  %v498_v59 = vmin.f32 %v494_v47, %v1091_v20  ;;  %v1178_v16 = vsel %vm81_vm1, %v456_v40, %v457_v41 }
 0x141   :  { %v501_v28 = vmin.f32 %v499_v60, %v497_v15 }
 0x142   :  { %v500_v26 = vmin.f32 %v498_v59, %v1178_v16 }
 0x144   :  { %508 = vrot.lane.b32.xlu0 %v1091_v20, %s826_s2  ;;  %510 = vrot.lane.b32.xlu1 %v1093_v21, %s826_s2 }
 0x1aa   :  { %v223_v29 = vpop.permute.xlu0 %222  ;;  %v225_v30 = vpop.permute.xlu1 %224 }
 0x1ab   :  { %v226_v45 = vsel %vm70_vm4, %v223_v29, inf  ;;  %v227_v46 = vsel %vm70_vm4, %v225_v30, inf }
 0x1ac   :  { %v234_v53 = vmin.f32 %v226_v45, %v1079_v6  ;;  %v235_v56 = vmin.f32 %v227_v46, %v1081_v10 }
 0x1ae   :  { %v503_v42 = vpop.permute.xlu0 %502  ;;  %v505_v43 = vpop.permute.xlu1 %504 }
 0x1af   :  { %v506_v61 = vsel %vm70_vm4, %v503_v42, inf  ;;  %v507_v62 = vsel %vm70_vm4, %v505_v43, inf }
 0x1b0   :  { %v514_v17 = vmin.f32 %v506_v61, %v1091_v20  ;;  %v515_v18 = vmin.f32 %v507_v62, %v1093_v21 }
 0x1b2   :  { %v229_v57 = vpop.permute.xlu0 %228  ;;  %v231_v58 = vpop.permute.xlu1 %230 }
 0x1b3   :  { %v232_v63 = vsel %vm71_vm5, %v229_v57, inf  ;;  %v233_v4 = vsel %vm71_vm5, %v231_v58, inf }
 0x1b4   :  { %v236_v12 = vmin.f32 %v234_v53, %v232_v63  ;;  %v237_v13 = vmin.f32 %v235_v56, %v233_v4 }
 0x1b6   :  { %v1182_v19 = vmin.f32 %v220_v11, %v236_v12  ;;  %v1184_v22 = vmin.f32 %v221_v51, %v237_v13  ;;  %v509_v23 = vpop.permute.xlu0 %508  ;;  %v511_v25 = vpop.permute.xlu1 %510 }
 0x1b7   :  { %v512_v27 = vsel %vm71_vm5, %v509_v23, inf  ;;  %v513_v29 = vsel %vm71_vm5, %v511_v25, inf }
 0x1b8   :  { %v516_v30 = vmin.f32 %v514_v17, %v512_v27  ;;  %v517_v38 = vmin.f32 %v515_v18, %v513_v29  ;;  %292 = vrot.lane.b32.xlu0 %v1182_v19, %s825_s24  ;;  %294 = vrot.lane.b32.xlu1 %v1184_v22, %s825_s24  ;;  %v240_v39 = vrot.slane %v1182_v19, 7  ;;  %v241_v40 = vrot.slane %v1184_v22, 7 }
 0x1b9   :  { %v246_v41 = vrot.slane %v1182_v19, 1  ;;  %v247_v42 = vrot.slane %v1184_v22, 1  ;;  %v174_v18 = vsel %vm61_vm2, %v1115_v31, -inf  ;;  %v183_v31 = vmax.f32 %v1119_v35, %v1081_v10 }
 0x1ba   :  { %v1199_v43 = vmin.f32 %v500_v26, %v516_v30  ;;  %v1201_v44 = vmin.f32 %v501_v28, %v517_v38  ;;  %v243_v45 = vsel %vm74_vm0, %v241_v40, %v240_v39  ;;  %v242_v57 = vsel %vm74_vm0, %v240_v39, %v241_v40 }
 0x1bb   :  { %v249_v49 = vsel %vm81_vm1, %v247_v42, %v246_v41  ;;  %v284_v56 = vsel %vm61_vm2, %v243_v45, inf  ;;  %v248_v60 = vsel %vm81_vm1, %v246_v41, %v247_v42  ;;  %v289_v11 = vmin.f32 %v242_v57, %v1184_v22 }
 0x1bc   :  { %572 = vrot.lane.b32.xlu0 %v1199_v43, %s825_s24  ;;  %574 = vrot.lane.b32.xlu1 %v1201_v44, %s825_s24  ;;  %v520_v46 = vrot.slane %v1199_v43, 7  ;;  %v521_v47 = vrot.slane %v1201_v44, 7  ;;  %v526_v51 = vrot.slane %v1199_v43, 1  ;;  %v527_v53 = vrot.slane %v1201_v44, 1 }
 0x1bd   :  { %v288_v59 = vmin.f32 %v284_v56, %v1182_v19  ;;  %v287_v4 = vsel %vm64_vm3, %v249_v49, inf  ;;  %v182_v28 = vmax.f32 %v174_v18, %v1079_v6  ;;  %v181_v29 = vsel %vm64_vm3, %v1123_v36, -inf }
 0x1be   :  { %v523_v58 = vsel %vm74_vm0, %v521_v47, %v520_v46  ;;  %v522_v61 = vsel %vm74_vm0, %v520_v46, %v521_v47  ;;  %v529_v62 = vsel %vm81_vm1, %v527_v53, %v526_v51  ;;  %v528_v23 = vsel %vm81_vm1, %v526_v51, %v527_v53 }
 0x1bf   :  { %v1232_v63 = vmin.f32 %v288_v59, %v248_v60  ;;  %v564_v12 = vsel %vm61_vm2, %v523_v58, inf  ;;  %v567_v13 = vsel %vm64_vm3, %v529_v62, inf  ;;  %v569_v17 = vmin.f32 %v522_v61, %v1201_v44 }
 0x1c0   :  { %298 = vrot.lane.b32.xlu0 %v1182_v19, %s826_s2  ;;  %300 = vrot.lane.b32.xlu1 %v1184_v22, %s826_s2  ;;  %v568_v15 = vmin.f32 %v564_v12, %v1199_v43  ;;  %v1248_v25 = vmin.f32 %v289_v11, %v287_v4  ;;  %v1269_v30 = vmax.f32 %v182_v28, %v1153_v50  ;;  %v454_v39 = vsel %vm61_vm2, %v1127_v37, -inf }
 0x1c1   :  { %v1256_v27 = vmin.f32 %v569_v17, %v567_v13  ;;  %v1271_v38 = vmax.f32 %v183_v31, %v181_v29  ;;  %v462_v35 = vmax.f32 %v454_v39, %v1091_v20  ;;  %v463_v36 = vmax.f32 %v1148_v48, %v1093_v21 }
 0x1c2   :  { %v1254_v26 = vmin.f32 %v568_v15, %v528_v23  ;;  %v461_v50 = vsel %vm64_vm3, %v1157_v52, -inf  ;;  %v244_v48 = vsel %vm61_vm2, %v243_v45, -inf  ;;  %v251_v41 = vsel %vm64_vm3, %v249_v49, -inf }
 0x1c3   :  { %v1291_v37 = vmax.f32 %v462_v35, %v1178_v16  ;;  %v1293_v40 = vmax.f32 %v463_v36, %v461_v50  ;;  %v252_v52 = vmax.f32 %v244_v48, %v1182_v19  ;;  %v253_v16 = vmax.f32 %v242_v57, %v1184_v22 }
 0x1c4   :  { %578 = vrot.lane.b32.xlu0 %v1199_v43, %s826_s2  ;;  %580 = vrot.lane.b32.xlu1 %v1201_v44, %s826_s2  ;;  %v524_v42 = vsel %vm61_vm2, %v523_v58, -inf  ;;  %v533_v51 = vmax.f32 %v522_v61, %v1201_v44  ;;  %v531_v49 = vsel %vm64_vm3, %v529_v62, -inf }
 0x1c5   :  { %v1323_v45 = vmax.f32 %v252_v52, %v248_v60  ;;  %v1325_v46 = vmax.f32 %v253_v16, %v251_v41  ;;  %v532_v47 = vmax.f32 %v524_v42, %v1199_v43 }
 0x1c6   :  { %v1337_v56 = vmax.f32 %v533_v51, %v531_v49 }
 0x1c7   :  { %v1335_v53 = vmax.f32 %v532_v47, %v528_v23 }
 0x1c8   :  { %124 = vrot.lane.b32.xlu0 %v1028_v24, %s825_s24  ;;  %126 = vrot.lane.b32.xlu1 %v1041_v32, %s825_s24 }
 0x1cc   :  { %186 = vrot.lane.b32.xlu0 %v1269_v30, %s825_s24  ;;  %188 = vrot.lane.b32.xlu1 %v1271_v38, %s825_s24 }
 0x1d0   :  { %404 = vrot.lane.b32.xlu0 %v1047_v33, %s825_s24  ;;  %406 = vrot.lane.b32.xlu1 %v1049_v34, %s825_s24 }
 0x1d4   :  { %466 = vrot.lane.b32.xlu0 %v1291_v37, %s825_s24  ;;  %468 = vrot.lane.b32.xlu1 %v1293_v40, %s825_s24 }
 0x1d8   :  { %130 = vrot.lane.b32.xlu0 %v1028_v24, %s826_s2  ;;  %132 = vrot.lane.b32.xlu1 %v1041_v32, %s826_s2 }
 0x1dc   :  { %192 = vrot.lane.b32.xlu0 %v1269_v30, %s826_s2  ;;  %194 = vrot.lane.b32.xlu1 %v1271_v38, %s826_s2 }
 0x1e0   :  { %410 = vrot.lane.b32.xlu0 %v1047_v33, %s826_s2  ;;  %412 = vrot.lane.b32.xlu1 %v1049_v34, %s826_s2 }
 0x1e4   :  { %472 = vrot.lane.b32.xlu0 %v1291_v37, %s826_s2  ;;  %474 = vrot.lane.b32.xlu1 %v1293_v40, %s826_s2 }
 0x1e8   :  { %256 = vrot.lane.b32.xlu0 %v1323_v45, %s825_s24  ;;  %258 = vrot.lane.b32.xlu1 %v1325_v46, %s825_s24 }
 0x1ec   :  { %536 = vrot.lane.b32.xlu0 %v1335_v53, %s825_s24  ;;  %538 = vrot.lane.b32.xlu1 %v1337_v56, %s825_s24 }
 0x1f0   :  { %262 = vrot.lane.b32.xlu0 %v1323_v45, %s826_s2  ;;  %264 = vrot.lane.b32.xlu1 %v1325_v46, %s826_s2 }
 0x1f4   :  { %542 = vrot.lane.b32.xlu0 %v1335_v53, %s826_s2  ;;  %544 = vrot.lane.b32.xlu1 %v1337_v56, %s826_s2 }
 0x22a   :  { %v293_v57 = vpop.permute.xlu0 %292  ;;  %v295_v58 = vpop.permute.xlu1 %294 }
 0x22b   :  { %v296_v61 = vsel %vm70_vm4, %v293_v57, inf  ;;  %v297_v62 = vsel %vm70_vm4, %v295_v58, inf }
 0x22c   :  { %v304_v4 = vmin.f32 %v296_v61, %v1182_v19  ;;  %v305_v11 = vmin.f32 %v297_v62, %v1184_v22 }
 0x22e   :  { %v573_v59 = vpop.permute.xlu0 %572  ;;  %v575_v60 = vpop.permute.xlu1 %574 }
 0x22f   :  { %v576_v18 = vsel %vm70_vm4, %v573_v59, inf  ;;  %v577_v23 = vsel %vm70_vm4, %v575_v60, inf }
 0x230   :  { %v584_v50 = vmin.f32 %v576_v18, %v1199_v43  ;;  %v585_v48 = vmin.f32 %v577_v23, %v1201_v44 }
 0x232   :  { %v299_v12 = vpop.permute.xlu0 %298  ;;  %v301_v13 = vpop.permute.xlu1 %300 }
 0x233   :  { %v302_v15 = vsel %vm71_vm5, %v299_v12, inf  ;;  %v303_v17 = vsel %vm71_vm5, %v301_v13, inf }
 0x234   :  { %v306_v28 = vmin.f32 %v304_v4, %v302_v15  ;;  %v307_v31 = vmin.f32 %v305_v11, %v303_v17 }
 0x236   :  { %v308_v29 = vmin.f32 %v1232_v63, %v306_v28  ;;  %v309_v39 = vmin.f32 %v1248_v25, %v307_v31  ;;  %v579_v35 = vpop.permute.xlu0 %578  ;;  %v581_v36 = vpop.permute.xlu1 %580 }
 0x237   :  { %v582_v52 = vsel %vm71_vm5, %v579_v35, inf  ;;  %v583_v16 = vsel %vm71_vm5, %v581_v36, inf }
 0x238   :  { %v310_v41 = vrot.slane %v308_v29, 7  ;;  %v316_v42 = vrot.slane %v308_v29, 1  ;;  %v311_v47 = vrot.slane %v309_v39, 7  ;;  %v317_v51 = vrot.slane %v309_v39, 1 }
 0x239   :  { %v586_v49 = vmin.f32 %v584_v50, %v582_v52  ;;  %v587_v63 = vmin.f32 %v585_v48, %v583_v16 }
 0x23a   :  { %v312_v25 = vsel %vm74_vm0, %v310_v41, %v311_v47  ;;  %v319_v57 = vsel %vm81_vm1, %v317_v51, %v316_v42  ;;  %v313_v58 = vsel %vm74_vm0, %v311_v47, %v310_v41  ;;  %v318_v59 = vsel %vm81_vm1, %v316_v42, %v317_v51  ;;  %v127_v52 = vpop.permute.xlu1 %126  ;;  %v125_v16 = vpop.permute.xlu0 %124 }
 0x23b   :  { %v588_v60 = vmin.f32 %v1254_v26, %v586_v49  ;;  %v589_v61 = vmin.f32 %v1256_v27, %v587_v63  ;;  %v321_v62 = vsel %vm64_vm3, %v319_v57, -inf  ;;  %v323_v4 = vmax.f32 %v312_v25, %v309_v39 }
 0x23c   :  { %v314_v18 = vsel %vm61_vm2, %v313_v58, -inf }
 0x23d   :  { %v590_v11 = vrot.slane %v588_v60, 7  ;;  %v596_v12 = vrot.slane %v588_v60, 1  ;;  %v591_v13 = vrot.slane %v589_v61, 7  ;;  %v597_v15 = vrot.slane %v589_v61, 1 }
 0x23e   :  { %v1385_v17 = vmax.f32 %v323_v4, %v321_v62  ;;  %v322_v23 = vmax.f32 %v314_v18, %v308_v29  ;;  %v189_v41 = vpop.permute.xlu1 %188  ;;  %v187_v42 = vpop.permute.xlu0 %186 }
 0x23f   :  { %v592_v28 = vsel %vm74_vm0, %v590_v11, %v591_v13  ;;  %v599_v26 = vsel %vm81_vm1, %v597_v15, %v596_v12  ;;  %v593_v35 = vsel %vm74_vm0, %v591_v13, %v590_v11  ;;  %v598_v29 = vsel %vm81_vm1, %v596_v12, %v597_v15 }
 0x240   :  { %328 = vrot.lane.b32.xlu1 %v1385_v17, %s825_s24  ;;  %v603_v27 = vmax.f32 %v592_v28, %v589_v61  ;;  %v1395_v31 = vmax.f32 %v322_v23, %v318_v59  ;;  %v601_v39 = vsel %vm64_vm3, %v599_v26, -inf  ;;  %v594_v50 = vsel %vm61_vm2, %v593_v35, -inf }
 0x241   :  { %v602_v48 = vmax.f32 %v594_v50, %v588_v60  ;;  %v191_v12 = vsel %vm70_vm4, %v189_v41, -inf  ;;  %v129_v13 = vsel %vm70_vm4, %v127_v52, -inf  ;;  %v190_v23 = vsel %vm70_vm4, %v187_v42, -inf }
 0x242   :  { %v1403_v36 = vmax.f32 %v603_v27, %v601_v39  ;;  %326 = vrot.lane.b32.xlu0 %v1395_v31, %s825_s24  ;;  %v407_v47 = vpop.permute.xlu1 %406  ;;  %v405_v51 = vpop.permute.xlu0 %404  ;;  %v199_v28 = vmax.f32 %v191_v12, %v1271_v38  ;;  %v128_v39 = vsel %vm70_vm4, %v125_v16, -inf  ;;  %v137_v35 = vmax.f32 %v129_v13, %v1041_v32 }
 0x243   :  { %v1411_v8 = vmax.f32 %v602_v48, %v598_v29  ;;  %v198_v52 = vmax.f32 %v190_v23, %v1269_v30  ;;  %v409_v38 = vsel %vm70_vm4, %v407_v47, -inf  ;;  %v408_v30 = vsel %vm70_vm4, %v405_v51, -inf }
 0x244   :  { %608 = vrot.lane.b32.xlu1 %v1403_v36, %s825_s24 }
 0x246   :  { %606 = vrot.lane.b32.xlu0 %v1411_v8, %s825_s24  ;;  %v469_v49 = vpop.permute.xlu1 %468  ;;  %v467_v63 = vpop.permute.xlu0 %466 }
 0x247   :  { %v471_v26 = vsel %vm70_vm4, %v469_v49, -inf  ;;  %v470_v42 = vsel %vm70_vm4, %v467_v63, -inf }
 0x248   :  { %334 = vrot.lane.b32.xlu1 %v1385_v17, %s826_s2  ;;  %v479_v16 = vmax.f32 %v471_v26, %v1293_v40 }
 0x24a   :  { %332 = vrot.lane.b32.xlu0 %v1395_v31, %s826_s2  ;;  %v133_v25 = vpop.permute.xlu1 %132  ;;  %v131_v57 = vpop.permute.xlu0 %130 }
 0x24b   :  { %v135_v27 = vsel %vm71_vm5, %v133_v25, -inf  ;;  %v134_v32 = vsel %vm71_vm5, %v131_v57, -inf  ;;  %v136_v25 = vmax.f32 %v128_v39, %v1028_v24  ;;  %v478_v57 = vmax.f32 %v470_v42, %v1291_v37 }
 0x24c   :  { %614 = vrot.lane.b32.xlu1 %v1403_v36, %s826_s2  ;;  %v139_v49 = vmax.f32 %v137_v35, %v135_v27 }
 0x24d   :  { %v138_v13 = vmax.f32 %v136_v25, %v134_v32 }
 0x24e   :  { %612 = vrot.lane.b32.xlu0 %v1411_v8, %s826_s2  ;;  %v195_v58 = vpop.permute.xlu1 %194  ;;  %v193_v59 = vpop.permute.xlu0 %192  ;;  %v141_v24 = vsub.f32 %v900_v3, %v139_v49 }
 0x24f   :  { %v197_v15 = vsel %vm71_vm5, %v195_v58, -inf  ;;  %v196_v29 = vsel %vm71_vm5, %v193_v59, -inf }
 0x250   :  { %v201_v50 = vmax.f32 %v199_v28, %v197_v15  ;;  %v200_v58 = vmax.f32 %v198_v52, %v196_v29  ;;  %v143_v39 = vmax.f32 %v141_v24, 0.0 }
 0x252   :  { %v413_v60 = vpop.permute.xlu1 %412  ;;  %v411_v61 = vpop.permute.xlu0 %410  ;;  %v203_v63 = vsub.f32 %v979_v54, %v201_v50 }
 0x253   :  { %v415_v47 = vsel %vm71_vm5, %v413_v60, -inf  ;;  %v414_v51 = vsel %vm71_vm5, %v411_v61, -inf  ;;  %v416_v60 = vmax.f32 %v408_v30, %v1047_v33 }
 0x254   :  { %v205_v54 = vmax.f32 %v203_v63, 0.0 }
 0x255   :  { %v418_v27 = vmax.f32 %v416_v60, %v414_v51 }
 0x256   :  { %v475_v62 = vpop.permute.xlu1 %474  ;;  %v473_v4 = vpop.permute.xlu0 %472  ;;  %v207_v33 = vmul.f32 %v205_v54, %v143_v39 }
 0x257   :  { %v477_v41 = vsel %vm71_vm5, %v475_v62, -inf  ;;  %v417_v62 = vmax.f32 %v409_v38, %v1049_v34  ;;  %v476_v40 = vsel %vm71_vm5, %v473_v4, -inf  ;;  %v202_v34 = vsub.f32 %v981_v55, %v200_v58 }
 0x258   :  { %v481_v12 = vmax.f32 %v479_v16, %v477_v41  ;;  %v480_v28 = vmax.f32 %v478_v57, %v476_v40  ;;  %v140_v4 = vsub.f32 %v892_v1, %v138_v13 }
 0x259   :  { %v419_v15 = vmax.f32 %v417_v62, %v415_v47  ;;  %v204_v35 = vmax.f32 %v202_v34, 0.0 }
 0x25a   :  { %v259_v11 = vpop.permute.xlu1 %258  ;;  %v257_v18 = vpop.permute.xlu0 %256  ;;  %v483_v26 = vsub.f32 %v995_v7, %v481_v12  ;;  %v482_v29 = vsub.f32 %v997_v9, %v480_v28  ;;  %v142_v38 = vmax.f32 %v140_v4, 0.0 }
 0x25b   :  { %v261_v37 = vsel %vm70_vm4, %v259_v11, -inf  ;;  %v421_v61 = vsub.f32 %v898_v2, %v419_v15  ;;  %v260_v7 = vsel %vm70_vm4, %v257_v18, -inf  ;;  %v420_v11 = vsub.f32 %v890_v0, %v418_v27 }
 0x25c   :  { %v485_v50 = vmax.f32 %v483_v26, 0.0  ;;  %v269_v1 = vmax.f32 %v261_v37, %v1325_v46  ;;  %v206_v16 = vmul.f32 %v204_v35, %v142_v38  ;;  %v484_v32 = vmax.f32 %v482_v29, 0.0 }
 0x25d   :  { %v423_v41 = vmax.f32 %v421_v61, 0.0  ;;  %v268_v49 = vmax.f32 %v260_v7, %v1323_v45  ;;  %v209_v18 = vsub.f32 %v205_v54, %v207_v33  ;;  %v422_v58 = vmax.f32 %v420_v11, 0.0 }
 0x25e   :  { %v539_v48 = vpop.permute.xlu1 %538  ;;  %v537_v59 = vpop.permute.xlu0 %536  ;;  %v208_v45 = vsub.f32 %v204_v35, %v206_v16 }
 0x25f   :  { %v541_v2 = vsel %vm70_vm4, %v539_v48, -inf  ;;  %v487_v30 = vmul.f32 %v485_v50, %v423_v41  ;;  %v540_v0 = vsel %vm70_vm4, %v537_v59, -inf  ;;  %v486_v12 = vmul.f32 %v484_v32, %v422_v58 }
 0x260   :  { %v549_v48 = vmax.f32 %v541_v2, %v1337_v56  ;;  %v548_v57 = vmax.f32 %v540_v0, %v1335_v53  ;;  %v211_v13 = vmax.f32 %v209_v18, 0.0 }
 0x261   :  { %v489_v24 = vsub.f32 %v485_v50, %v487_v30  ;;  %v488_v60 = vsub.f32 %v484_v32, %v486_v12 }
 0x262   :  { %v265_v23 = vpop.permute.xlu1 %264  ;;  %v263_v3 = vpop.permute.xlu0 %262 }
 0x263   :  { %v267_v55 = vsel %vm71_vm5, %v265_v23, -inf  ;;  %v266_v9 = vsel %vm71_vm5, %v263_v3, -inf  ;;  %v210_v23 = vmax.f32 %v208_v45, 0.0  ;;  %v491_v34 = vmax.f32 %v489_v24, 0.0 }
 0x264   :  { %v271_v42 = vmax.f32 %v269_v1, %v267_v55  ;;  %v270_v47 = vmax.f32 %v268_v49, %v266_v9  ;;  %v490_v37 = vmax.f32 %v488_v60, 0.0 }
 0x265   :  { %v212_v53 = vadd.f32 %v210_v23, %v142_v38  ;;  %v493_v61 = vadd.f32 %v491_v34, %v423_v41 }
 0x266   :  { %v545_v52 = vpop.permute.xlu1 %544  ;;  %v543_v25 = vpop.permute.xlu0 %542  ;;  %v273_v62 = vsub.f32 %v1081_v10, %v271_v42  ;;  %v272_v51 = vsub.f32 %v1079_v6, %v270_v47  ;;  %v213_v10 = vadd.f32 %v211_v13, %v143_v39  ;;  %v492_v50 = vadd.f32 %v490_v37, %v422_v58 }
 0x267   :  { %v547_v46 = vsel %vm71_vm5, %v545_v52, -inf  ;;  %v546_v63 = vsel %vm71_vm5, %v543_v25, -inf }
 0x268   :  { %v551_v40 = vmax.f32 %v549_v48, %v547_v46  ;;  %v550_v15 = vmax.f32 %v548_v57, %v546_v63  ;;  %v275_v59 = vmax.f32 %v273_v62, 0.0  ;;  %v274_v54 = vmax.f32 %v272_v51, 0.0 }
 0x26a   :  { %v553_v56 = vsub.f32 %v1093_v21, %v551_v40  ;;  %v552_v26 = vsub.f32 %v1091_v20, %v550_v15  ;;  %v277_v4 = vmul.f32 %v275_v59, %v213_v10  ;;  %v276_v6 = vmul.f32 %v274_v54, %v212_v53 }
 0x26c   :  { %v555_v27 = vmax.f32 %v553_v56, 0.0  ;;  %v554_v29 = vmax.f32 %v552_v26, 0.0  ;;  %v279_v55 = vsub.f32 %v275_v59, %v277_v4  ;;  %v278_v52 = vsub.f32 %v274_v54, %v276_v6 }
 0x26e   :  { %v557_v33 = vmul.f32 %v555_v27, %v493_v61  ;;  %v556_v38 = vmul.f32 %v554_v29, %v492_v50  ;;  %v281_v41 = vmax.f32 %v279_v55, 0.0  ;;  %v280_v30 = vmax.f32 %v278_v52, 0.0 }
 0x270   :  { %v559_v9 = vsub.f32 %v555_v27, %v557_v33  ;;  %v558_v0 = vsub.f32 %v554_v29, %v556_v38  ;;  %v283_v63 = vadd.f32 %v281_v41, %v213_v10  ;;  %v282_v15 = vadd.f32 %v280_v30, %v212_v53 }
 0x272   :  { %v561_v47 = vmax.f32 %v559_v9, 0.0  ;;  %v560_v13 = vmax.f32 %v558_v0, 0.0 }
 0x274   :  { %v563_v59 = vadd.f32 %v561_v47, %v493_v61 }
 0x2b2   :  { %v329_v28 = vpop.permute.xlu1 %328 }
 0x2b3   :  { %v331_v21 = vsel %vm70_vm4, %v329_v28, -inf }
 0x2b4   :  { %v327_v3 = vpop.permute.xlu0 %326  ;;  %v339_v7 = vmax.f32 %v331_v21, %v1385_v17  ;;  %v723_v21 = vld [vmem:[#allocation7] sm:$0xff] }
 0x2b5   :  { %v330_v20 = vsel %vm70_vm4, %v327_v3, -inf }
 0x2b6   :  { %v609_v35 = vpop.permute.xlu1 %608  ;;  %v338_v16 = vmax.f32 %v330_v20, %v1395_v31 }
 0x2b7   :  { %v611_v11 = vsel %vm70_vm4, %v609_v35, -inf  ;;  %v722_v35 = vld [vmem:[#allocation7 + $0x8] sm:$0xff] }
 0x2b8   :  { %v607_v39 = vpop.permute.xlu0 %606  ;;  %v619_v17 = vmax.f32 %v611_v11, %v1403_v36 }
 0x2b9   :  { %v610_v49 = vsel %vm70_vm4, %v607_v39, -inf }
 0x2ba   :  { %v335_v1 = vpop.permute.xlu1 %334  ;;  %v618_v36 = vmax.f32 %v610_v49, %v1411_v8 }
 0x2bb   :  { %v337_v2 = vsel %vm71_vm5, %v335_v1, -inf }
 0x2bc   :  { %v341_v42 = vmax.f32 %v339_v7, %v337_v2  ;;  %v333_v32 = vpop.permute.xlu0 %332  ;;  %v725_v7 = vld [vmem:[#allocation5] sm:$0xff] }
 0x2bd   :  { %v336_v46 = vsel %vm71_vm5, %v333_v32, -inf }
 0x2be   :  { %v343_v25 = vsub.f32 %v1184_v22, %v341_v42  ;;  %v615_v18 = vpop.permute.xlu1 %614  ;;  %v340_v48 = vmax.f32 %v338_v16, %v336_v46 }
 0x2bf   :  { %v617_v58 = vsel %vm71_vm5, %v615_v18, -inf }
 0x2c0   :  { %v345_v31 = vmax.f32 %v343_v25, 0.0  ;;  %v621_v62 = vmax.f32 %v619_v17, %v617_v58  ;;  %v342_v40 = vsub.f32 %v1182_v19, %v340_v48  ;;  %v613_v45 = vpop.permute.xlu0 %612  ;;  %v562_v19 = vadd.f32 %v560_v13, %v492_v50  ;;  %v724_v50 = vld [vmem:[#allocation5 + $0x8] sm:$0xff] }
 0x2c1   :  { %v616_v12 = vsel %vm71_vm5, %v613_v45, -inf }
 0x2c2   :  { %v623_v22 = vsub.f32 %v1201_v44, %v621_v62  ;;  %v347_v57 = vmul.f32 %v345_v31, %v283_v63  ;;  %v344_v24 = vmax.f32 %v342_v40, 0.0  ;;  %v620_v51 = vmax.f32 %v618_v36, %v616_v12 }
 0x2c4   :  { %v625_v56 = vmax.f32 %v623_v22, 0.0  ;;  %v349_v23 = vsub.f32 %v345_v31, %v347_v57  ;;  %v622_v60 = vsub.f32 %v1199_v43, %v620_v51  ;;  %v346_v34 = vmul.f32 %v344_v24, %v282_v15 }
 0x2c6   :  { %v627_v8 = vmul.f32 %v625_v56, %v563_v59  ;;  %v351_v10 = vmax.f32 %v349_v23, 0.0  ;;  %v624_v28 = vmax.f32 %v622_v60, 0.0  ;;  %v348_v54 = vsub.f32 %v344_v24, %v346_v34 }
 0x2c8   :  { %v629_v44 = vsub.f32 %v625_v56, %v627_v8  ;;  %v353_v26 = vadd.f32 %v351_v10, %v283_v63  ;;  %v626_v14 = vmul.f32 %v624_v28, %v562_v19  ;;  %v350_v4 = vmax.f32 %v348_v54, 0.0 }
 0x2ca   :  { %v631_v27 = vmax.f32 %v629_v44, 0.0  ;;  %v628_v37 = vsub.f32 %v624_v28, %v626_v14  ;;  %v352_v3 = vadd.f32 %v350_v4, %v282_v15  ;;  %v635_v53 = vmul.f32 %v722_v35, %v353_v26 }
 0x2cc   :  { %v633_v61 = vadd.f32 %v631_v27, %v563_v59  ;;  %v630_v6 = vmax.f32 %v628_v37, 0.0  ;;  %v646_v29 = vadd.f32 %v353_v26, %v352_v3  ;;  %v634_v43 = vmul.f32 %v723_v21, %v352_v3 }
 0x2ce   :  { %647 = vadd.xlane.f32.xlu1 %v646_v29  ;;  %v636_v55 = vadd.f32 %v635_v53, %v634_v43  ;;  %v632_v33 = vadd.f32 %v630_v6, %v562_v19  ;;  %v657_v39 = vmul.f32 %v724_v50, %v633_v61 }
 0x2d0   :  { %637 = vadd.xlane.f32.xlu0 %v636_v55  ;;  %v656_v20 = vmul.f32 %v725_v7, %v632_v33  ;;  %v668_v52 = vadd.f32 %v633_v61, %v632_v33 }
 0x2d2   :  { %v658_v1 = vadd.f32 %v657_v39, %v656_v20 }
 0x2d4   :  { %659 = vadd.xlane.f32.xlu0 %v658_v1 }
 0x2d8   :  { %669 = vadd.xlane.f32.xlu0 %v668_v52 }
 0x35b   :  { %v648_v38 = vpop.xlane.xlu1 %647 }
 0x35c   :  { %v649_v11 = vrot.slane %v648_v38, 4 }
 0x35d   :  { %v638_v2 = vpop.xlane.xlu0 %637 }
 0x35e   :  { %v650_v41 = vadd.f32 %v649_v11, %v648_v38  ;;  %v639_v9 = vrot.slane %v638_v2, 4 }
 0x360   :  { %v651_v42 = vrot.slane %v650_v41, 2  ;;  %v640_v16 = vadd.f32 %v639_v9, %v638_v2 }
 0x361   :  { %v660_v32 = vpop.xlane.xlu0 %659 }
 0x362   :  { %v652_v17 = vadd.f32 %v651_v42, %v650_v41  ;;  %v641_v49 = vrot.slane %v640_v16, 2  ;;  %v661_v25 = vrot.slane %v660_v32, 4 }
 0x364   :  { %v662_v46 = vadd.f32 %v661_v25, %v660_v32  ;;  %v642_v18 = vadd.f32 %v641_v49, %v640_v16  ;;  %v653_v0 = vrot.slane %v652_v17, 1 }
 0x365   :  { %v670_v30 = vpop.xlane.xlu0 %669 }
 0x366   :  { %v663_v48 = vrot.slane %v662_v46, 2  ;;  %v671_v58 = vrot.slane %v670_v30, 4  ;;  %v643_v47 = vrot.slane %v642_v18, 1  ;;  %v654_v36 = vadd.f32 %v653_v0, %v652_v17 }
 0x368   :  { %v672_v31 = vadd.f32 %v671_v58, %v670_v30  ;;  %v644_v62 = vadd.f32 %v643_v47, %v642_v18  ;;  %v664_v63 = vadd.f32 %v663_v48, %v662_v46 }
 0x36a   :  { %v673_v40 = vrot.slane %v672_v31, 2  ;;  %706 = vpush %v644_v62  ;;  %v665_v45 = vrot.slane %v664_v63, 1 }
 0x36b   :  { %708 = vpush %v654_v36 }
 0x36c   :  { %v674_v22 = vadd.f32 %v673_v40, %v672_v31  ;;  %v666_v12 = vadd.f32 %v665_v45, %v664_v63 }
 0x36e   :  { %710 = vpush %v666_v12  ;;  %v675_v57 = vrot.slane %v674_v22, 1 }
 0x370   :  { %v676_v13 = vadd.f32 %v675_v57, %v674_v22 }
 0x372   :  { %712 = vpush %v676_v13 }
 0x39b   :  { %s707_s22 = spop %706 }
 0x39c   :  { %s709_s23 = spop %708  ;;  %v686_v56 = vstv %s707_s22 }
 0x39d   :  { %v684_v15 = vstv %s709_s23 }
 0x39f   :  { %s711_s25 = spop %710 }
 0x3a0   :  { %v681_v24 = vstv %s711_s25 }
 0x3a3   :  { %s713_s26 = spop %712 }
 0x3a4   :  { %v682_v51 = vstv %s713_s26 }
 0x3a5   :  { %v683_v59 = vsel %vm680_vm6, %v681_v24, %v682_v51 }
 0x3a6   :  { %v685_v23 = vsel %vm679_vm7, %v684_v15, %v683_v59 }
 0x3a7   :  { %v687_v60 = vsel %vm678_vm8, %v686_v56, %v685_v23 }
 0x3a8   :  { %688 = vst [vmem:[#allocation8] sm:$0xff] %v687_v60 }
 0x3a9   :  { %803 = shalt.err (!%p800_p0)
}
 0x3aa   :  { %s804_s5 = scalar_lea.hbm %s1537_s3, 128 }
 0x3ab   :  { %p805_p1 = scmp.ne.s32.totalorder %s1537_s3, %s804_s5  ;;  %p808_p2 = scmp.lt.u32.totalorder %s804_s5, %s1537_s3 }
 0x3ad   :  { %p810_p3 = pnand %p808_p2, %p805_p1 }
 0x3af   :  { %813 = shalt.err (!%p810_p3)
}
 0x3b0   :  { %698 = dma.vmem_to_hbm [thread:$0]  %s696_s28, 128, %s1537_s3, [#allocation4]  }
 0x3b1   :  { %818 = dma.done.wait [#allocation4], 128  }
 0x3b2   :  { %819 = vsyncadd [#allocation4], 4294967168 }
 0x3b3   :  { %702 = vsyncpa [#allocation3], 1 }
 0x3b4   :  { %703 = vsyncpa [#allocation6], 1 }
 0x3b5   :  { %704 = vsyncpa [#allocation4], 1 }

</bundles_post_ra>
